<compile_context>
chip_gen: v7x
topology: tpu7x:2x2x1
jax: 0.10.0
libtpu: 0.0.40
codegen_flags: <defaults>
</compile_context>

<pallas_src>
import numpy as np
import jax
import jax.numpy as jnp
from jax import lax
from jax.experimental import pallas as pl
from jax.experimental.pallas import tpu as pltpu

K1 = 64      # temporal conv kernel size
PAD1 = 32    # temporal conv padding
K3 = 16      # separable conv kernel size
PAD3 = 8     # separable conv padding
CH = 32      # channel count after the folded depthwise conv


def _elu(h):
    # exp(min(h,0)) - 1 keeps the discarded branch from overflowing; expm1 would
    # be marginally more accurate for tiny negative h (~1e-7 abs) but plain exp
    # is the guaranteed-supported EUP lowering and is well inside tolerance.
    return jnp.where(h > 0.0, h, jnp.exp(jnp.minimum(h, 0.0)) - 1.0)


# ----------------------------- Pallas kernel --------------------------------
def _make_kernel(TB, L2, L4, nc):
    W2 = L2 * TB                      # lanes per pool(4) quarter-slab
    U = 8 * L4                        # separable-conv columns AvgPool(8) consumes
    HPW = (L2 + 2 * PAD3) * TB        # padded, time-major pooled width

    def kernel(im1_ref, w1k_ref, bsh_ref, w3t_ref, wfcm_ref, bfc_ref,
               out_ref, hp_ref, h3_ref):
        b1 = bsh_ref[:, 0:1]          # folded depthwise*BN1 + BN2 bias   (CH, 1)
        b3 = bsh_ref[:, 1:2]          # BN3 shift                         (CH, 1)

        # --- temporal conv (BN1/depthwise/BN2 folded) + ELU + AvgPool1d(4) ---
        # im2col columns arrive in (r, j, b) order (t = 4j + r), so the pool is
        # the sum of 4 contiguous, aligned quarter-slabs.  One batched matmul
        # per quarter (N = L2*TB) keeps live values small.
        pooled = jnp.zeros((CH, W2), jnp.float32)
        for r in range(4):
            hr = jnp.dot(w1k_ref[...], im1_ref[0, :, r * W2:(r + 1) * W2],
                         preferred_element_type=jnp.float32) + b1
            pooled = pooled + _elu(hr)                        # ELU before pool

        # zero-padded, time-major (time, batch) buffer for the separable conv
        zpad = jnp.zeros((CH, PAD3 * TB), jnp.float32)
        hp_ref[:, 0:PAD3 * TB] = zpad
        hp_ref[:, PAD3 * TB:(PAD3 + L2) * TB] = pooled
        hp_ref[:, (PAD3 + L2) * TB:HPW] = zpad

        # --- separable conv (BN3 scale + 1/4 folded): K3 batched tap matmuls ---
        # Time-major layout makes each tap one full-width contiguous slice.
        h3 = jnp.dot(w3t_ref[0], hp_ref[:, 0:U * TB],
                     preferred_element_type=jnp.float32)
        for k in range(1, K3):
            h3 = h3 + jnp.dot(w3t_ref[k], hp_ref[:, k * TB:(k + U) * TB],
                              preferred_element_type=jnp.float32)
        h3_ref[...] = _elu(h3 + b3)                           # (CH, U*TB)

        # --- AvgPool1d(8) + flatten + fc, fused ------------------------------
        # out[:, b] = sum_m Wm @ (sum_s h3[:, u=8m+s, b]); the 1/8 factor and
        # the PyTorch channel-major flatten order live inside Wm (wrapper), so
        # no relayout / flatten stores are needed.
        acc = jnp.zeros((nc, TB), jnp.float32)
        for m in range(L4):
            z = h3_ref[:, (8 * m) * TB:(8 * m + 1) * TB]
            for s in range(1, 8):
                z = z + h3_ref[:, (8 * m + s) * TB:(8 * m + s + 1) * TB]
            acc = acc + jnp.dot(wfcm_ref[m], z, preferred_element_type=jnp.float32)
        out_ref[0] = acc + bfc_ref[...]                       # (nc, TB)

    return kernel


# ------------------------------ wrapper --------------------------------------
def eegnet1d_forward(x, params, batch_tile=None):
    B, C, T = x.shape
    nc = params['bfc'].shape[0]

    L1 = T + 2 * PAD1 - K1 + 1        # temporal conv output length  (= T + 1)
    L2 = L1 // 4                      # after AvgPool1d(4)
    L3 = L2 + 2 * PAD3 - K3 + 1       # separable conv output length (= L2 + 1)
    L4 = L3 // 8                      # after AvgPool1d(8)
    assert CH * L4 == params['wfc'].shape[1], "fc input size mismatch"

    # ---- fold BN1 + depthwise(k=1, groups=16) + BN2 into a 32-channel conv1 ----
    idx = jnp.arange(CH) // 2
    g = params['bn2_scale'] * params['w2']                                 # (32,)
    w1_eff = (g * params['bn1_scale'][idx])[:, None, None] * params['w1'][idx]
    b1_eff = g * params['bn1_shift'][idx] + params['bn2_shift']            # (32,)
    w1k = jnp.transpose(w1_eff, (0, 2, 1)).reshape(CH, K1 * C)             # col = k*C + c

    # ---- fold BN3 scale and the AvgPool(4) 1/4 into the separable conv taps ----
    w3_eff = (0.25 * params['bn3_scale'])[:, None, None] * params['w3']    # (32,32,16)
    w3t = jnp.transpose(w3_eff, (2, 0, 1))                                 # (K3, CH, CH)

    # ---- fold AvgPool(8) 1/8 + PyTorch flatten order into per-window fc mats ---
    wfcm = (0.125 * params['wfc']).reshape(nc, CH, L4).transpose(2, 0, 1)  # (L4,nc,CH)
    bfc = params['bfc'].reshape(nc, 1)
    bsh = jnp.stack([b1_eff, params['bn3_shift']], axis=1)                 # (CH, 2)

    # ---- batch tiling: nb >= 2 so both v7x TensorCores get work; TB <= 8 keeps
    # the per-step footprint (<~2 MiB) far under every default VMEM limit.
    # Pass batch_tile (and, if very large, a vmem_limit_bytes) to scale up. ----
    TB = batch_tile or max(1, min(8, -(-B // 2)))
    nb = -(-B // TB)
    Bp = nb * TB

    xp = jnp.pad(x.astype(jnp.float32), ((0, Bp - B), (0, 0), (PAD1, PAD1)))

    # ---- wrapper-side im2col for the temporal conv: only the 4*L2 columns the
    # pool consumes, columns ordered (r, j, b) with t = 4j + r.  The shifted
    # windows arrive via DMA instead of in-kernel masked copies. ----
    Tc = 4 * L2
    wins = jnp.stack([xp[:, :, k:k + Tc] for k in range(K1)], axis=1)      # (Bp,K1,C,Tc)
    wins = wins.reshape(nb, TB, K1 * C, L2, 4)
    im1 = jnp.transpose(wins, (0, 2, 4, 3, 1)).reshape(nb, K1 * C, 4 * L2 * TB)

    kernel = _make_kernel(TB, L2, L4, nc)
    U = 8 * L4

    out3 = pl.pallas_call(
        kernel,
        out_shape=jax.ShapeDtypeStruct((nb, nc, TB), jnp.float32),
        grid_spec=pltpu.PrefetchScalarGridSpec(
            num_scalar_prefetch=0,
            grid=(nb,),
            in_specs=[
                pl.BlockSpec((1, K1 * C, 4 * L2 * TB), lambda i: (i, 0, 0)),  # im2col
                pl.BlockSpec((CH, K1 * C), lambda i: (0, 0)),                 # conv1 W
                pl.BlockSpec((CH, 2), lambda i: (0, 0)),                      # shifts
                pl.BlockSpec((K3, CH, CH), lambda i: (0, 0, 0)),              # conv3 taps
                pl.BlockSpec((L4, nc, CH), lambda i: (0, 0, 0)),              # fc mats
                pl.BlockSpec((nc, 1), lambda i: (0, 0)),                      # fc bias
            ],
            out_specs=pl.BlockSpec((1, nc, TB), lambda i: (i, 0, 0)),
            scratch_shapes=[
                pltpu.VMEM((CH, (L2 + 2 * PAD3) * TB), jnp.float32),  # padded pooled
                pltpu.VMEM((CH, U * TB), jnp.float32),                # conv3 activation
            ],
        ),
        compiler_params=pltpu.CompilerParams(
            dimension_semantics=("parallel",)),
    )(im1, w1k, bsh, w3t, wfcm, bfc)

    return jnp.transpose(out3, (0, 2, 1)).reshape(Bp, nc)[:B]


# -------------------------- deterministic params -----------------------------
def init_params(key, num_channels, num_samples, num_classes):
    L4 = num_samples // 32
    ks = jax.random.split(key, 16)
    eps = 1e-5

    def bn(kg, kb, km, kv, c):
        gamma = 1.0 + 0.1 * jax.random.normal(kg, (c,), jnp.float32)
        beta = 0.1 * jax.random.normal(kb, (c,), jnp.float32)
        mean = 0.05 * jax.random.normal(km, (c,), jnp.float32)
        var = 0.8 + 0.4 * jax.random.uniform(kv, (c,), jnp.float32)
        scale = gamma / jnp.sqrt(var + eps)
        shift = beta - mean * scale
        return scale, shift

    s1, b1 = bn(ks[1], ks[2], ks[3], ks[4], 16)
    s2, b2 = bn(ks[6], ks[7], ks[8], ks[9], 32)
    s3, b3 = bn(ks[11], ks[12], ks[13], ks[14], 32)

    return {
        'w1': 0.05 * jax.random.normal(ks[0], (16, num_channels, 64), jnp.float32),
        'bn1_scale': s1, 'bn1_shift': b1,
        'w2': 0.3 * jax.random.normal(ks[5], (32,), jnp.float32),   # (32,1,1) depthwise flattened
        'bn2_scale': s2, 'bn2_shift': b2,
        'w3': 0.05 * jax.random.normal(ks[10], (32, 32, 16), jnp.float32),
        'bn3_scale': s3, 'bn3_shift': b3,
        'wfc': 0.05 * jax.random.normal(ks[15], (num_classes, 32 * L4), jnp.float32),
        'bfc': 0.1 * jnp.arange(num_classes, dtype=jnp.float32) / num_classes,
    }


# ----------------------------- pure-JAX reference ----------------------------
def reference_forward(x, params):
    dn = ('NCH', 'OIH', 'NCH')
    h = lax.conv_general_dilated(x, params['w1'], (1,), [(32, 32)], dimension_numbers=dn)
    h = h * params['bn1_scale'][None, :, None] + params['bn1_shift'][None, :, None]
    h = h[:, jnp.arange(32) // 2, :] * params['w2'][None, :, None]   # depthwise k=1, groups=16
    h = h * params['bn2_scale'][None, :, None] + params['bn2_shift'][None, :, None]
    h = jnp.where(h > 0, h, jnp.expm1(h))
    B, Cc, L = h.shape
    L2 = L // 4
    h = h[:, :, :L2 * 4].reshape(B, Cc, L2, 4).mean(-1)
    h = lax.conv_general_dilated(h, params['w3'], (1,), [(8, 8)], dimension_numbers=dn)
    h = h * params['bn3_scale'][None, :, None] + params['bn3_shift'][None, :, None]
    h = jnp.where(h > 0, h, jnp.expm1(h))
    B, Cc, L = h.shape
    L4 = L // 8
    h = h[:, :, :L4 * 8].reshape(B, Cc, L4, 8).mean(-1)
    flat = h.reshape(B, -1)
    return flat @ params['wfc'].T + params['bfc']


if __name__ == "__main__":
    # small shapes consistent with EEGNet1D(num_channels=C, num_samples=T, num_classes=NC)
    B, C, T, NC = 3, 4, 128, 10
    key = jax.random.PRNGKey(0)
    kx, kp = jax.random.split(key)
    x = jax.random.normal(kx, (B, C, T), jnp.float32)
    params = init_params(kp, C, T, NC)

    y = eegnet1d_forward(x, params)       # TB=2, nb=2 (exercises tiling + padding)
    y = jax.block_until_ready(y)
    assert y.shape == (B, NC)

    y_ref = reference_forward(x, params)
    np.testing.assert_allclose(np.asarray(y), np.asarray(y_ref), rtol=1e-3, atol=1e-3)
    print("KERNEL_OK")
</pallas_src>

<mosaic_0001>
module attributes {stable_mosaic.version = 11 : i64} {
  func.func @kernel(%arg0: i32, %arg1: memref<1x256x256xf32, #tpu.memory_space<vmem>>, %arg2: memref<32x256xf32, #tpu.memory_space<vmem>>, %arg3: memref<32x2xf32, #tpu.memory_space<vmem>>, %arg4: memref<16x32x32xf32, #tpu.memory_space<vmem>>, %arg5: memref<4x10x32xf32, #tpu.memory_space<vmem>>, %arg6: memref<10x1xf32, #tpu.memory_space<vmem>>, %arg7: memref<1x10x2xf32, #tpu.memory_space<vmem>>, %arg8: memref<32x96xf32, #tpu.memory_space<vmem>>, %arg9: memref<32x64xf32, #tpu.memory_space<vmem>>) attributes {dimension_semantics = [#tpu.dimension_semantics<parallel>], iteration_bounds = array<i64: 2>, scalar_prefetch = 0 : i64, scratch_operands = 2 : i64, tpu.core_type = #tpu.core_type<tc>, window_params = [{transform_indices = @transform_0, window_bounds = array<i64: 1, 256, 256>}, {pipeline_mode = #tpu.pipeline_mode<synchronous>, transform_indices = @transform_1, window_bounds = array<i64: 32, 256>}, {pipeline_mode = #tpu.pipeline_mode<synchronous>, transform_indices = @transform_2, window_bounds = array<i64: 32, 2>}, {pipeline_mode = #tpu.pipeline_mode<synchronous>, transform_indices = @transform_3, window_bounds = array<i64: 16, 32, 32>}, {pipeline_mode = #tpu.pipeline_mode<synchronous>, transform_indices = @transform_4, window_bounds = array<i64: 4, 10, 32>}, {pipeline_mode = #tpu.pipeline_mode<synchronous>, transform_indices = @transform_5, window_bounds = array<i64: 10, 1>}, {transform_indices = @transform_6, window_bounds = array<i64: 1, 10, 2>}]} {
    %c0 = arith.constant 0 : index
    %c0_0 = arith.constant 0 : index
    %0 = vector.load %arg3[%c0, %c0_0] : memref<32x2xf32, #tpu.memory_space<vmem>>, vector<32x1xf32>
    %c0_1 = arith.constant 0 : index
    %c1 = arith.constant 1 : index
    %1 = vector.load %arg3[%c0_1, %c1] : memref<32x2xf32, #tpu.memory_space<vmem>>, vector<32x1xf32>
    %cst = arith.constant 0.000000e+00 : f32
    %2 = vector.broadcast %cst : f32 to vector<32x64xf32>
    %c0_2 = arith.constant 0 : index
    %c0_3 = arith.constant 0 : index
    %3 = vector.load %arg2[%c0_2, %c0_3] : memref<32x256xf32, #tpu.memory_space<vmem>>, vector<32x256xf32>
    %c0_4 = arith.constant 0 : index
    %c0_5 = arith.constant 0 : index
    %c0_6 = arith.constant 0 : index
    %4 = vector.load %arg1[%c0_4, %c0_5, %c0_6] : memref<1x256x256xf32, #tpu.memory_space<vmem>>, vector<1x256x64xf32>
    %5 = vector.shape_cast %4 : vector<1x256x64xf32> to vector<256x64xf32>
    %cst_7 = arith.constant dense<0.000000e+00> : vector<32x64xf32>
    %6 = tpu.matmul %3, %5, %cst_7 {dimension_numbers = #tpu.dot_dimension_numbers<[1], [0], [0], [1], [0, 0, 1, 1], [], []>} : vector<32x256xf32>, vector<256x64xf32>, vector<32x64xf32> -> vector<32x64xf32>
    %7 = vector.broadcast %0 : vector<32x1xf32> to vector<32x64xf32>
    %8 = arith.addf %6, %7 : vector<32x64xf32>
    %cst_8 = arith.constant 0.000000e+00 : f32
    %9 = vector.broadcast %cst_8 : f32 to vector<32x64xf32>
    %10 = arith.cmpf ogt, %8, %9 : vector<32x64xf32>
    %cst_9 = arith.constant 0.000000e+00 : f32
    %11 = vector.broadcast %cst_9 : f32 to vector<32x64xf32>
    %12 = arith.minimumf %8, %11 : vector<32x64xf32>
    %13 = math.exp %12 : vector<32x64xf32>
    %cst_10 = arith.constant 1.000000e+00 : f32
    %14 = vector.broadcast %cst_10 : f32 to vector<32x64xf32>
    %15 = arith.subf %13, %14 : vector<32x64xf32>
    %16 = arith.select %10, %8, %15 : vector<32x64xi1>, vector<32x64xf32>
    %17 = arith.addf %2, %16 : vector<32x64xf32>
    %c0_11 = arith.constant 0 : index
    %c0_12 = arith.constant 0 : index
    %18 = vector.load %arg2[%c0_11, %c0_12] : memref<32x256xf32, #tpu.memory_space<vmem>>, vector<32x256xf32>
    %c0_13 = arith.constant 0 : index
    %c0_14 = arith.constant 0 : index
    %c64 = arith.constant 64 : index
    %19 = vector.load %arg1[%c0_13, %c0_14, %c64] : memref<1x256x256xf32, #tpu.memory_space<vmem>>, vector<1x256x64xf32>
    %20 = vector.shape_cast %19 : vector<1x256x64xf32> to vector<256x64xf32>
    %cst_15 = arith.constant dense<0.000000e+00> : vector<32x64xf32>
    %21 = tpu.matmul %18, %20, %cst_15 {dimension_numbers = #tpu.dot_dimension_numbers<[1], [0], [0], [1], [0, 0, 1, 1], [], []>} : vector<32x256xf32>, vector<256x64xf32>, vector<32x64xf32> -> vector<32x64xf32>
    %22 = vector.broadcast %0 : vector<32x1xf32> to vector<32x64xf32>
    %23 = arith.addf %21, %22 : vector<32x64xf32>
    %cst_16 = arith.constant 0.000000e+00 : f32
    %24 = vector.broadcast %cst_16 : f32 to vector<32x64xf32>
    %25 = arith.cmpf ogt, %23, %24 : vector<32x64xf32>
    %cst_17 = arith.constant 0.000000e+00 : f32
    %26 = vector.broadcast %cst_17 : f32 to vector<32x64xf32>
    %27 = arith.minimumf %23, %26 : vector<32x64xf32>
    %28 = math.exp %27 : vector<32x64xf32>
    %cst_18 = arith.constant 1.000000e+00 : f32
    %29 = vector.broadcast %cst_18 : f32 to vector<32x64xf32>
    %30 = arith.subf %28, %29 : vector<32x64xf32>
    %31 = arith.select %25, %23, %30 : vector<32x64xi1>, vector<32x64xf32>
    %32 = arith.addf %17, %31 : vector<32x64xf32>
    %c0_19 = arith.constant 0 : index
    %c0_20 = arith.constant 0 : index
    %33 = vector.load %arg2[%c0_19, %c0_20] : memref<32x256xf32, #tpu.memory_space<vmem>>, vector<32x256xf32>
    %c0_21 = arith.constant 0 : index
    %c0_22 = arith.constant 0 : index
    %c128 = arith.constant 128 : index
    %34 = vector.load %arg1[%c0_21, %c0_22, %c128] : memref<1x256x256xf32, #tpu.memory_space<vmem>>, vector<1x256x64xf32>
    %35 = vector.shape_cast %34 : vector<1x256x64xf32> to vector<256x64xf32>
    %cst_23 = arith.constant dense<0.000000e+00> : vector<32x64xf32>
    %36 = tpu.matmul %33, %35, %cst_23 {dimension_numbers = #tpu.dot_dimension_numbers<[1], [0], [0], [1], [0, 0, 1, 1], [], []>} : vector<32x256xf32>, vector<256x64xf32>, vector<32x64xf32> -> vector<32x64xf32>
    %37 = vector.broadcast %0 : vector<32x1xf32> to vector<32x64xf32>
    %38 = arith.addf %36, %37 : vector<32x64xf32>
    %cst_24 = arith.constant 0.000000e+00 : f32
    %39 = vector.broadcast %cst_24 : f32 to vector<32x64xf32>
    %40 = arith.cmpf ogt, %38, %39 : vector<32x64xf32>
    %cst_25 = arith.constant 0.000000e+00 : f32
    %41 = vector.broadcast %cst_25 : f32 to vector<32x64xf32>
    %42 = arith.minimumf %38, %41 : vector<32x64xf32>
    %43 = math.exp %42 : vector<32x64xf32>
    %cst_26 = arith.constant 1.000000e+00 : f32
    %44 = vector.broadcast %cst_26 : f32 to vector<32x64xf32>
    %45 = arith.subf %43, %44 : vector<32x64xf32>
    %46 = arith.select %40, %38, %45 : vector<32x64xi1>, vector<32x64xf32>
    %47 = arith.addf %32, %46 : vector<32x64xf32>
    %c0_27 = arith.constant 0 : index
    %c0_28 = arith.constant 0 : index
    %48 = vector.load %arg2[%c0_27, %c0_28] : memref<32x256xf32, #tpu.memory_space<vmem>>, vector<32x256xf32>
    %c0_29 = arith.constant 0 : index
    %c0_30 = arith.constant 0 : index
    %c192 = arith.constant 192 : index
    %49 = vector.load %arg1[%c0_29, %c0_30, %c192] : memref<1x256x256xf32, #tpu.memory_space<vmem>>, vector<1x256x64xf32>
    %50 = vector.shape_cast %49 : vector<1x256x64xf32> to vector<256x64xf32>
    %cst_31 = arith.constant dense<0.000000e+00> : vector<32x64xf32>
    %51 = tpu.matmul %48, %50, %cst_31 {dimension_numbers = #tpu.dot_dimension_numbers<[1], [0], [0], [1], [0, 0, 1, 1], [], []>} : vector<32x256xf32>, vector<256x64xf32>, vector<32x64xf32> -> vector<32x64xf32>
    %52 = vector.broadcast %0 : vector<32x1xf32> to vector<32x64xf32>
    %53 = arith.addf %51, %52 : vector<32x64xf32>
    %cst_32 = arith.constant 0.000000e+00 : f32
    %54 = vector.broadcast %cst_32 : f32 to vector<32x64xf32>
    %55 = arith.cmpf ogt, %53, %54 : vector<32x64xf32>
    %cst_33 = arith.constant 0.000000e+00 : f32
    %56 = vector.broadcast %cst_33 : f32 to vector<32x64xf32>
    %57 = arith.minimumf %53, %56 : vector<32x64xf32>
    %58 = math.exp %57 : vector<32x64xf32>
    %cst_34 = arith.constant 1.000000e+00 : f32
    %59 = vector.broadcast %cst_34 : f32 to vector<32x64xf32>
    %60 = arith.subf %58, %59 : vector<32x64xf32>
    %61 = arith.select %55, %53, %60 : vector<32x64xi1>, vector<32x64xf32>
    %62 = arith.addf %47, %61 : vector<32x64xf32>
    %cst_35 = arith.constant 0.000000e+00 : f32
    %63 = vector.broadcast %cst_35 : f32 to vector<32x16xf32>
    %c0_36 = arith.constant 0 : index
    %c0_37 = arith.constant 0 : index
    %64 = vector.load %arg8[%c0_36, %c0_37] : memref<32x96xf32, #tpu.memory_space<vmem>>, vector<32x16xf32>
    tpu.vector_store %arg8[%c0_36, %c0_37], %63 {strides = array<i32>} : memref<32x96xf32, #tpu.memory_space<vmem>>, vector<32x16xf32>,
    %c0_38 = arith.constant 0 : index
    %c16 = arith.constant 16 : index
    %65 = vector.load %arg8[%c0_38, %c16] : memref<32x96xf32, #tpu.memory_space<vmem>>, vector<32x64xf32>
    tpu.vector_store %arg8[%c0_38, %c16], %62 {strides = array<i32>} : memref<32x96xf32, #tpu.memory_space<vmem>>, vector<32x64xf32>,
    %c0_39 = arith.constant 0 : index
    %c80 = arith.constant 80 : index
    %66 = vector.load %arg8[%c0_39, %c80] : memref<32x96xf32, #tpu.memory_space<vmem>>, vector<32x16xf32>
    tpu.vector_store %arg8[%c0_39, %c80], %63 {strides = array<i32>} : memref<32x96xf32, #tpu.memory_space<vmem>>, vector<32x16xf32>,
    %c0_40 = arith.constant 0 : index
    %c0_41 = arith.constant 0 : index
    %c0_42 = arith.constant 0 : index
    %67 = vector.load %arg4[%c0_40, %c0_41, %c0_42] : memref<16x32x32xf32, #tpu.memory_space<vmem>>, vector<1x32x32xf32>
    %68 = vector.shape_cast %67 : vector<1x32x32xf32> to vector<32x32xf32>
    %c0_43 = arith.constant 0 : index
    %c0_44 = arith.constant 0 : index
    %69 = vector.load %arg8[%c0_43, %c0_44] : memref<32x96xf32, #tpu.memory_space<vmem>>, vector<32x64xf32>
    %cst_45 = arith.constant dense<0.000000e+00> : vector<32x64xf32>
    %70 = tpu.matmul %68, %69, %cst_45 {dimension_numbers = #tpu.dot_dimension_numbers<[1], [0], [0], [1], [0, 0, 1, 1], [], []>} : vector<32x32xf32>, vector<32x64xf32>, vector<32x64xf32> -> vector<32x64xf32>
    %c1_46 = arith.constant 1 : index
    %c0_47 = arith.constant 0 : index
    %c0_48 = arith.constant 0 : index
    %71 = vector.load %arg4[%c1_46, %c0_47, %c0_48] : memref<16x32x32xf32, #tpu.memory_space<vmem>>, vector<1x32x32xf32>
    %72 = vector.shape_cast %71 : vector<1x32x32xf32> to vector<32x32xf32>
    %c0_49 = arith.constant 0 : index
    %c2 = arith.constant 2 : index
    %73 = vector.load %arg8[%c0_49, %c2] : memref<32x96xf32, #tpu.memory_space<vmem>>, vector<32x64xf32>
    %cst_50 = arith.constant dense<0.000000e+00> : vector<32x64xf32>
    %74 = tpu.matmul %72, %73, %cst_50 {dimension_numbers = #tpu.dot_dimension_numbers<[1], [0], [0], [1], [0, 0, 1, 1], [], []>} : vector<32x32xf32>, vector<32x64xf32>, vector<32x64xf32> -> vector<32x64xf32>
    %75 = arith.addf %70, %74 : vector<32x64xf32>
    %c2_51 = arith.constant 2 : index
    %c0_52 = arith.constant 0 : index
    %c0_53 = arith.constant 0 : index
    %76 = vector.load %arg4[%c2_51, %c0_52, %c0_53] : memref<16x32x32xf32, #tpu.memory_space<vmem>>, vector<1x32x32xf32>
    %77 = vector.shape_cast %76 : vector<1x32x32xf32> to vector<32x32xf32>
    %c0_54 = arith.constant 0 : index
    %c4 = arith.constant 4 : index
    %78 = vector.load %arg8[%c0_54, %c4] : memref<32x96xf32, #tpu.memory_space<vmem>>, vector<32x64xf32>
    %cst_55 = arith.constant dense<0.000000e+00> : vector<32x64xf32>
    %79 = tpu.matmul %77, %78, %cst_55 {dimension_numbers = #tpu.dot_dimension_numbers<[1], [0], [0], [1], [0, 0, 1, 1], [], []>} : vector<32x32xf32>, vector<32x64xf32>, vector<32x64xf32> -> vector<32x64xf32>
    %80 = arith.addf %75, %79 : vector<32x64xf32>
    %c3 = arith.constant 3 : index
    %c0_56 = arith.constant 0 : index
    %c0_57 = arith.constant 0 : index
    %81 = vector.load %arg4[%c3, %c0_56, %c0_57] : memref<16x32x32xf32, #tpu.memory_space<vmem>>, vector<1x32x32xf32>
    %82 = vector.shape_cast %81 : vector<1x32x32xf32> to vector<32x32xf32>
    %c0_58 = arith.constant 0 : index
    %c6 = arith.constant 6 : index
    %83 = vector.load %arg8[%c0_58, %c6] : memref<32x96xf32, #tpu.memory_space<vmem>>, vector<32x64xf32>
    %cst_59 = arith.constant dense<0.000000e+00> : vector<32x64xf32>
    %84 = tpu.matmul %82, %83, %cst_59 {dimension_numbers = #tpu.dot_dimension_numbers<[1], [0], [0], [1], [0, 0, 1, 1], [], []>} : vector<32x32xf32>, vector<32x64xf32>, vector<32x64xf32> -> vector<32x64xf32>
    %85 = arith.addf %80, %84 : vector<32x64xf32>
    %c4_60 = arith.constant 4 : index
    %c0_61 = arith.constant 0 : index
    %c0_62 = arith.constant 0 : index
    %86 = vector.load %arg4[%c4_60, %c0_61, %c0_62] : memref<16x32x32xf32, #tpu.memory_space<vmem>>, vector<1x32x32xf32>
    %87 = vector.shape_cast %86 : vector<1x32x32xf32> to vector<32x32xf32>
    %c0_63 = arith.constant 0 : index
    %c8 = arith.constant 8 : index
    %88 = vector.load %arg8[%c0_63, %c8] : memref<32x96xf32, #tpu.memory_space<vmem>>, vector<32x64xf32>
    %cst_64 = arith.constant dense<0.000000e+00> : vector<32x64xf32>
    %89 = tpu.matmul %87, %88, %cst_64 {dimension_numbers = #tpu.dot_dimension_numbers<[1], [0], [0], [1], [0, 0, 1, 1], [], []>} : vector<32x32xf32>, vector<32x64xf32>, vector<32x64xf32> -> vector<32x64xf32>
    %90 = arith.addf %85, %89 : vector<32x64xf32>
    %c5 = arith.constant 5 : index
    %c0_65 = arith.constant 0 : index
    %c0_66 = arith.constant 0 : index
    %91 = vector.load %arg4[%c5, %c0_65, %c0_66] : memref<16x32x32xf32, #tpu.memory_space<vmem>>, vector<1x32x32xf32>
    %92 = vector.shape_cast %91 : vector<1x32x32xf32> to vector<32x32xf32>
    %c0_67 = arith.constant 0 : index
    %c10 = arith.constant 10 : index
    %93 = vector.load %arg8[%c0_67, %c10] : memref<32x96xf32, #tpu.memory_space<vmem>>, vector<32x64xf32>
    %cst_68 = arith.constant dense<0.000000e+00> : vector<32x64xf32>
    %94 = tpu.matmul %92, %93, %cst_68 {dimension_numbers = #tpu.dot_dimension_numbers<[1], [0], [0], [1], [0, 0, 1, 1], [], []>} : vector<32x32xf32>, vector<32x64xf32>, vector<32x64xf32> -> vector<32x64xf32>
    %95 = arith.addf %90, %94 : vector<32x64xf32>
    %c6_69 = arith.constant 6 : index
    %c0_70 = arith.constant 0 : index
    %c0_71 = arith.constant 0 : index
    %96 = vector.load %arg4[%c6_69, %c0_70, %c0_71] : memref<16x32x32xf32, #tpu.memory_space<vmem>>, vector<1x32x32xf32>
    %97 = vector.shape_cast %96 : vector<1x32x32xf32> to vector<32x32xf32>
    %c0_72 = arith.constant 0 : index
    %c12 = arith.constant 12 : index
    %98 = vector.load %arg8[%c0_72, %c12] : memref<32x96xf32, #tpu.memory_space<vmem>>, vector<32x64xf32>
    %cst_73 = arith.constant dense<0.000000e+00> : vector<32x64xf32>
    %99 = tpu.matmul %97, %98, %cst_73 {dimension_numbers = #tpu.dot_dimension_numbers<[1], [0], [0], [1], [0, 0, 1, 1], [], []>} : vector<32x32xf32>, vector<32x64xf32>, vector<32x64xf32> -> vector<32x64xf32>
    %100 = arith.addf %95, %99 : vector<32x64xf32>
    %c7 = arith.constant 7 : index
    %c0_74 = arith.constant 0 : index
    %c0_75 = arith.constant 0 : index
    %101 = vector.load %arg4[%c7, %c0_74, %c0_75] : memref<16x32x32xf32, #tpu.memory_space<vmem>>, vector<1x32x32xf32>
    %102 = vector.shape_cast %101 : vector<1x32x32xf32> to vector<32x32xf32>
    %c0_76 = arith.constant 0 : index
    %c14 = arith.constant 14 : index
    %103 = vector.load %arg8[%c0_76, %c14] : memref<32x96xf32, #tpu.memory_space<vmem>>, vector<32x64xf32>
    %cst_77 = arith.constant dense<0.000000e+00> : vector<32x64xf32>
    %104 = tpu.matmul %102, %103, %cst_77 {dimension_numbers = #tpu.dot_dimension_numbers<[1], [0], [0], [1], [0, 0, 1, 1], [], []>} : vector<32x32xf32>, vector<32x64xf32>, vector<32x64xf32> -> vector<32x64xf32>
    %105 = arith.addf %100, %104 : vector<32x64xf32>
    %c8_78 = arith.constant 8 : index
    %c0_79 = arith.constant 0 : index
    %c0_80 = arith.constant 0 : index
    %106 = vector.load %arg4[%c8_78, %c0_79, %c0_80] : memref<16x32x32xf32, #tpu.memory_space<vmem>>, vector<1x32x32xf32>
    %107 = vector.shape_cast %106 : vector<1x32x32xf32> to vector<32x32xf32>
    %c0_81 = arith.constant 0 : index
    %c16_82 = arith.constant 16 : index
    %108 = vector.load %arg8[%c0_81, %c16_82] : memref<32x96xf32, #tpu.memory_space<vmem>>, vector<32x64xf32>
    %cst_83 = arith.constant dense<0.000000e+00> : vector<32x64xf32>
    %109 = tpu.matmul %107, %108, %cst_83 {dimension_numbers = #tpu.dot_dimension_numbers<[1], [0], [0], [1], [0, 0, 1, 1], [], []>} : vector<32x32xf32>, vector<32x64xf32>, vector<32x64xf32> -> vector<32x64xf32>
    %110 = arith.addf %105, %109 : vector<32x64xf32>
    %c9 = arith.constant 9 : index
    %c0_84 = arith.constant 0 : index
    %c0_85 = arith.constant 0 : index
    %111 = vector.load %arg4[%c9, %c0_84, %c0_85] : memref<16x32x32xf32, #tpu.memory_space<vmem>>, vector<1x32x32xf32>
    %112 = vector.shape_cast %111 : vector<1x32x32xf32> to vector<32x32xf32>
    %c0_86 = arith.constant 0 : index
    %c18 = arith.constant 18 : index
    %113 = vector.load %arg8[%c0_86, %c18] : memref<32x96xf32, #tpu.memory_space<vmem>>, vector<32x64xf32>
    %cst_87 = arith.constant dense<0.000000e+00> : vector<32x64xf32>
    %114 = tpu.matmul %112, %113, %cst_87 {dimension_numbers = #tpu.dot_dimension_numbers<[1], [0], [0], [1], [0, 0, 1, 1], [], []>} : vector<32x32xf32>, vector<32x64xf32>, vector<32x64xf32> -> vector<32x64xf32>
    %115 = arith.addf %110, %114 : vector<32x64xf32>
    %c10_88 = arith.constant 10 : index
    %c0_89 = arith.constant 0 : index
    %c0_90 = arith.constant 0 : index
    %116 = vector.load %arg4[%c10_88, %c0_89, %c0_90] : memref<16x32x32xf32, #tpu.memory_space<vmem>>, vector<1x32x32xf32>
    %117 = vector.shape_cast %116 : vector<1x32x32xf32> to vector<32x32xf32>
    %c0_91 = arith.constant 0 : index
    %c20 = arith.constant 20 : index
    %118 = vector.load %arg8[%c0_91, %c20] : memref<32x96xf32, #tpu.memory_space<vmem>>, vector<32x64xf32>
    %cst_92 = arith.constant dense<0.000000e+00> : vector<32x64xf32>
    %119 = tpu.matmul %117, %118, %cst_92 {dimension_numbers = #tpu.dot_dimension_numbers<[1], [0], [0], [1], [0, 0, 1, 1], [], []>} : vector<32x32xf32>, vector<32x64xf32>, vector<32x64xf32> -> vector<32x64xf32>
    %120 = arith.addf %115, %119 : vector<32x64xf32>
    %c11 = arith.constant 11 : index
    %c0_93 = arith.constant 0 : index
    %c0_94 = arith.constant 0 : index
    %121 = vector.load %arg4[%c11, %c0_93, %c0_94] : memref<16x32x32xf32, #tpu.memory_space<vmem>>, vector<1x32x32xf32>
    %122 = vector.shape_cast %121 : vector<1x32x32xf32> to vector<32x32xf32>
    %c0_95 = arith.constant 0 : index
    %c22 = arith.constant 22 : index
    %123 = vector.load %arg8[%c0_95, %c22] : memref<32x96xf32, #tpu.memory_space<vmem>>, vector<32x64xf32>
    %cst_96 = arith.constant dense<0.000000e+00> : vector<32x64xf32>
    %124 = tpu.matmul %122, %123, %cst_96 {dimension_numbers = #tpu.dot_dimension_numbers<[1], [0], [0], [1], [0, 0, 1, 1], [], []>} : vector<32x32xf32>, vector<32x64xf32>, vector<32x64xf32> -> vector<32x64xf32>
    %125 = arith.addf %120, %124 : vector<32x64xf32>
    %c12_97 = arith.constant 12 : index
    %c0_98 = arith.constant 0 : index
    %c0_99 = arith.constant 0 : index
    %126 = vector.load %arg4[%c12_97, %c0_98, %c0_99] : memref<16x32x32xf32, #tpu.memory_space<vmem>>, vector<1x32x32xf32>
    %127 = vector.shape_cast %126 : vector<1x32x32xf32> to vector<32x32xf32>
    %c0_100 = arith.constant 0 : index
    %c24 = arith.constant 24 : index
    %128 = vector.load %arg8[%c0_100, %c24] : memref<32x96xf32, #tpu.memory_space<vmem>>, vector<32x64xf32>
    %cst_101 = arith.constant dense<0.000000e+00> : vector<32x64xf32>
    %129 = tpu.matmul %127, %128, %cst_101 {dimension_numbers = #tpu.dot_dimension_numbers<[1], [0], [0], [1], [0, 0, 1, 1], [], []>} : vector<32x32xf32>, vector<32x64xf32>, vector<32x64xf32> -> vector<32x64xf32>
    %130 = arith.addf %125, %129 : vector<32x64xf32>
    %c13 = arith.constant 13 : index
    %c0_102 = arith.constant 0 : index
    %c0_103 = arith.constant 0 : index
    %131 = vector.load %arg4[%c13, %c0_102, %c0_103] : memref<16x32x32xf32, #tpu.memory_space<vmem>>, vector<1x32x32xf32>
    %132 = vector.shape_cast %131 : vector<1x32x32xf32> to vector<32x32xf32>
    %c0_104 = arith.constant 0 : index
    %c26 = arith.constant 26 : index
    %133 = vector.load %arg8[%c0_104, %c26] : memref<32x96xf32, #tpu.memory_space<vmem>>, vector<32x64xf32>
    %cst_105 = arith.constant dense<0.000000e+00> : vector<32x64xf32>
    %134 = tpu.matmul %132, %133, %cst_105 {dimension_numbers = #tpu.dot_dimension_numbers<[1], [0], [0], [1], [0, 0, 1, 1], [], []>} : vector<32x32xf32>, vector<32x64xf32>, vector<32x64xf32> -> vector<32x64xf32>
    %135 = arith.addf %130, %134 : vector<32x64xf32>
    %c14_106 = arith.constant 14 : index
    %c0_107 = arith.constant 0 : index
    %c0_108 = arith.constant 0 : index
    %136 = vector.load %arg4[%c14_106, %c0_107, %c0_108] : memref<16x32x32xf32, #tpu.memory_space<vmem>>, vector<1x32x32xf32>
    %137 = vector.shape_cast %136 : vector<1x32x32xf32> to vector<32x32xf32>
    %c0_109 = arith.constant 0 : index
    %c28 = arith.constant 28 : index
    %138 = vector.load %arg8[%c0_109, %c28] : memref<32x96xf32, #tpu.memory_space<vmem>>, vector<32x64xf32>
    %cst_110 = arith.constant dense<0.000000e+00> : vector<32x64xf32>
    %139 = tpu.matmul %137, %138, %cst_110 {dimension_numbers = #tpu.dot_dimension_numbers<[1], [0], [0], [1], [0, 0, 1, 1], [], []>} : vector<32x32xf32>, vector<32x64xf32>, vector<32x64xf32> -> vector<32x64xf32>
    %140 = arith.addf %135, %139 : vector<32x64xf32>
    %c15 = arith.constant 15 : index
    %c0_111 = arith.constant 0 : index
    %c0_112 = arith.constant 0 : index
    %141 = vector.load %arg4[%c15, %c0_111, %c0_112] : memref<16x32x32xf32, #tpu.memory_space<vmem>>, vector<1x32x32xf32>
    %142 = vector.shape_cast %141 : vector<1x32x32xf32> to vector<32x32xf32>
    %c0_113 = arith.constant 0 : index
    %c30 = arith.constant 30 : index
    %143 = vector.load %arg8[%c0_113, %c30] : memref<32x96xf32, #tpu.memory_space<vmem>>, vector<32x64xf32>
    %cst_114 = arith.constant dense<0.000000e+00> : vector<32x64xf32>
    %144 = tpu.matmul %142, %143, %cst_114 {dimension_numbers = #tpu.dot_dimension_numbers<[1], [0], [0], [1], [0, 0, 1, 1], [], []>} : vector<32x32xf32>, vector<32x64xf32>, vector<32x64xf32> -> vector<32x64xf32>
    %145 = arith.addf %140, %144 : vector<32x64xf32>
    %146 = vector.broadcast %1 : vector<32x1xf32> to vector<32x64xf32>
    %147 = arith.addf %145, %146 : vector<32x64xf32>
    %cst_115 = arith.constant 0.000000e+00 : f32
    %148 = vector.broadcast %cst_115 : f32 to vector<32x64xf32>
    %149 = arith.cmpf ogt, %147, %148 : vector<32x64xf32>
    %cst_116 = arith.constant 0.000000e+00 : f32
    %150 = vector.broadcast %cst_116 : f32 to vector<32x64xf32>
    %151 = arith.minimumf %147, %150 : vector<32x64xf32>
    %152 = math.exp %151 : vector<32x64xf32>
    %cst_117 = arith.constant 1.000000e+00 : f32
    %153 = vector.broadcast %cst_117 : f32 to vector<32x64xf32>
    %154 = arith.subf %152, %153 : vector<32x64xf32>
    %155 = arith.select %149, %147, %154 : vector<32x64xi1>, vector<32x64xf32>
    %c0_118 = arith.constant 0 : index
    %c0_119 = arith.constant 0 : index
    %156 = vector.load %arg9[%c0_118, %c0_119] : memref<32x64xf32, #tpu.memory_space<vmem>>, vector<32x64xf32>
    tpu.vector_store %arg9[%c0_118, %c0_119], %155 {strides = array<i32>} : memref<32x64xf32, #tpu.memory_space<vmem>>, vector<32x64xf32>,
    %cst_120 = arith.constant 0.000000e+00 : f32
    %157 = vector.broadcast %cst_120 : f32 to vector<10x2xf32>
    %c0_121 = arith.constant 0 : index
    %c0_122 = arith.constant 0 : index
    %158 = vector.load %arg9[%c0_121, %c0_122] : memref<32x64xf32, #tpu.memory_space<vmem>>, vector<32x2xf32>
    %c0_123 = arith.constant 0 : index
    %c2_124 = arith.constant 2 : index
    %159 = vector.load %arg9[%c0_123, %c2_124] : memref<32x64xf32, #tpu.memory_space<vmem>>, vector<32x2xf32>
    %160 = arith.addf %158, %159 : vector<32x2xf32>
    %c0_125 = arith.constant 0 : index
    %c4_126 = arith.constant 4 : index
    %161 = vector.load %arg9[%c0_125, %c4_126] : memref<32x64xf32, #tpu.memory_space<vmem>>, vector<32x2xf32>
    %162 = arith.addf %160, %161 : vector<32x2xf32>
    %c0_127 = arith.constant 0 : index
    %c6_128 = arith.constant 6 : index
    %163 = vector.load %arg9[%c0_127, %c6_128] : memref<32x64xf32, #tpu.memory_space<vmem>>, vector<32x2xf32>
    %164 = arith.addf %162, %163 : vector<32x2xf32>
    %c0_129 = arith.constant 0 : index
    %c8_130 = arith.constant 8 : index
    %165 = vector.load %arg9[%c0_129, %c8_130] : memref<32x64xf32, #tpu.memory_space<vmem>>, vector<32x2xf32>
    %166 = arith.addf %164, %165 : vector<32x2xf32>
    %c0_131 = arith.constant 0 : index
    %c10_132 = arith.constant 10 : index
    %167 = vector.load %arg9[%c0_131, %c10_132] : memref<32x64xf32, #tpu.memory_space<vmem>>, vector<32x2xf32>
    %168 = arith.addf %166, %167 : vector<32x2xf32>
    %c0_133 = arith.constant 0 : index
    %c12_134 = arith.constant 12 : index
    %169 = vector.load %arg9[%c0_133, %c12_134] : memref<32x64xf32, #tpu.memory_space<vmem>>, vector<32x2xf32>
    %170 = arith.addf %168, %169 : vector<32x2xf32>
    %c0_135 = arith.constant 0 : index
    %c14_136 = arith.constant 14 : index
    %171 = vector.load %arg9[%c0_135, %c14_136] : memref<32x64xf32, #tpu.memory_space<vmem>>, vector<32x2xf32>
    %172 = arith.addf %170, %171 : vector<32x2xf32>
    %c0_137 = arith.constant 0 : index
    %c0_138 = arith.constant 0 : index
    %c0_139 = arith.constant 0 : index
    %173 = vector.load %arg5[%c0_137, %c0_138, %c0_139] : memref<4x10x32xf32, #tpu.memory_space<vmem>>, vector<1x10x32xf32>
    %174 = vector.shape_cast %173 : vector<1x10x32xf32> to vector<10x32xf32>
    %cst_140 = arith.constant dense<0.000000e+00> : vector<10x2xf32>
    %175 = tpu.matmul %174, %172, %cst_140 {dimension_numbers = #tpu.dot_dimension_numbers<[1], [0], [0], [1], [0, 0, 1, 1], [], []>} : vector<10x32xf32>, vector<32x2xf32>, vector<10x2xf32> -> vector<10x2xf32>
    %176 = arith.addf %157, %175 : vector<10x2xf32>
    %c0_141 = arith.constant 0 : index
    %c16_142 = arith.constant 16 : index
    %177 = vector.load %arg9[%c0_141, %c16_142] : memref<32x64xf32, #tpu.memory_space<vmem>>, vector<32x2xf32>
    %c0_143 = arith.constant 0 : index
    %c18_144 = arith.constant 18 : index
    %178 = vector.load %arg9[%c0_143, %c18_144] : memref<32x64xf32, #tpu.memory_space<vmem>>, vector<32x2xf32>
    %179 = arith.addf %177, %178 : vector<32x2xf32>
    %c0_145 = arith.constant 0 : index
    %c20_146 = arith.constant 20 : index
    %180 = vector.load %arg9[%c0_145, %c20_146] : memref<32x64xf32, #tpu.memory_space<vmem>>, vector<32x2xf32>
    %181 = arith.addf %179, %180 : vector<32x2xf32>
    %c0_147 = arith.constant 0 : index
    %c22_148 = arith.constant 22 : index
    %182 = vector.load %arg9[%c0_147, %c22_148] : memref<32x64xf32, #tpu.memory_space<vmem>>, vector<32x2xf32>
    %183 = arith.addf %181, %182 : vector<32x2xf32>
    %c0_149 = arith.constant 0 : index
    %c24_150 = arith.constant 24 : index
    %184 = vector.load %arg9[%c0_149, %c24_150] : memref<32x64xf32, #tpu.memory_space<vmem>>, vector<32x2xf32>
    %185 = arith.addf %183, %184 : vector<32x2xf32>
    %c0_151 = arith.constant 0 : index
    %c26_152 = arith.constant 26 : index
    %186 = vector.load %arg9[%c0_151, %c26_152] : memref<32x64xf32, #tpu.memory_space<vmem>>, vector<32x2xf32>
    %187 = arith.addf %185, %186 : vector<32x2xf32>
    %c0_153 = arith.constant 0 : index
    %c28_154 = arith.constant 28 : index
    %188 = vector.load %arg9[%c0_153, %c28_154] : memref<32x64xf32, #tpu.memory_space<vmem>>, vector<32x2xf32>
    %189 = arith.addf %187, %188 : vector<32x2xf32>
    %c0_155 = arith.constant 0 : index
    %c30_156 = arith.constant 30 : index
    %190 = vector.load %arg9[%c0_155, %c30_156] : memref<32x64xf32, #tpu.memory_space<vmem>>, vector<32x2xf32>
    %191 = arith.addf %189, %190 : vector<32x2xf32>
    %c1_157 = arith.constant 1 : index
    %c0_158 = arith.constant 0 : index
    %c0_159 = arith.constant 0 : index
    %192 = vector.load %arg5[%c1_157, %c0_158, %c0_159] : memref<4x10x32xf32, #tpu.memory_space<vmem>>, vector<1x10x32xf32>
    %193 = vector.shape_cast %192 : vector<1x10x32xf32> to vector<10x32xf32>
    %cst_160 = arith.constant dense<0.000000e+00> : vector<10x2xf32>
    %194 = tpu.matmul %193, %191, %cst_160 {dimension_numbers = #tpu.dot_dimension_numbers<[1], [0], [0], [1], [0, 0, 1, 1], [], []>} : vector<10x32xf32>, vector<32x2xf32>, vector<10x2xf32> -> vector<10x2xf32>
    %195 = arith.addf %176, %194 : vector<10x2xf32>
    %c0_161 = arith.constant 0 : index
    %c32 = arith.constant 32 : index
    %196 = vector.load %arg9[%c0_161, %c32] : memref<32x64xf32, #tpu.memory_space<vmem>>, vector<32x2xf32>
    %c0_162 = arith.constant 0 : index
    %c34 = arith.constant 34 : index
    %197 = vector.load %arg9[%c0_162, %c34] : memref<32x64xf32, #tpu.memory_space<vmem>>, vector<32x2xf32>
    %198 = arith.addf %196, %197 : vector<32x2xf32>
    %c0_163 = arith.constant 0 : index
    %c36 = arith.constant 36 : index
    %199 = vector.load %arg9[%c0_163, %c36] : memref<32x64xf32, #tpu.memory_space<vmem>>, vector<32x2xf32>
    %200 = arith.addf %198, %199 : vector<32x2xf32>
    %c0_164 = arith.constant 0 : index
    %c38 = arith.constant 38 : index
    %201 = vector.load %arg9[%c0_164, %c38] : memref<32x64xf32, #tpu.memory_space<vmem>>, vector<32x2xf32>
    %202 = arith.addf %200, %201 : vector<32x2xf32>
    %c0_165 = arith.constant 0 : index
    %c40 = arith.constant 40 : index
    %203 = vector.load %arg9[%c0_165, %c40] : memref<32x64xf32, #tpu.memory_space<vmem>>, vector<32x2xf32>
    %204 = arith.addf %202, %203 : vector<32x2xf32>
    %c0_166 = arith.constant 0 : index
    %c42 = arith.constant 42 : index
    %205 = vector.load %arg9[%c0_166, %c42] : memref<32x64xf32, #tpu.memory_space<vmem>>, vector<32x2xf32>
    %206 = arith.addf %204, %205 : vector<32x2xf32>
    %c0_167 = arith.constant 0 : index
    %c44 = arith.constant 44 : index
    %207 = vector.load %arg9[%c0_167, %c44] : memref<32x64xf32, #tpu.memory_space<vmem>>, vector<32x2xf32>
    %208 = arith.addf %206, %207 : vector<32x2xf32>
    %c0_168 = arith.constant 0 : index
    %c46 = arith.constant 46 : index
    %209 = vector.load %arg9[%c0_168, %c46] : memref<32x64xf32, #tpu.memory_space<vmem>>, vector<32x2xf32>
    %210 = arith.addf %208, %209 : vector<32x2xf32>
    %c2_169 = arith.constant 2 : index
    %c0_170 = arith.constant 0 : index
    %c0_171 = arith.constant 0 : index
    %211 = vector.load %arg5[%c2_169, %c0_170, %c0_171] : memref<4x10x32xf32, #tpu.memory_space<vmem>>, vector<1x10x32xf32>
    %212 = vector.shape_cast %211 : vector<1x10x32xf32> to vector<10x32xf32>
    %cst_172 = arith.constant dense<0.000000e+00> : vector<10x2xf32>
    %213 = tpu.matmul %212, %210, %cst_172 {dimension_numbers = #tpu.dot_dimension_numbers<[1], [0], [0], [1], [0, 0, 1, 1], [], []>} : vector<10x32xf32>, vector<32x2xf32>, vector<10x2xf32> -> vector<10x2xf32>
    %214 = arith.addf %195, %213 : vector<10x2xf32>
    %c0_173 = arith.constant 0 : index
    %c48 = arith.constant 48 : index
    %215 = vector.load %arg9[%c0_173, %c48] : memref<32x64xf32, #tpu.memory_space<vmem>>, vector<32x2xf32>
    %c0_174 = arith.constant 0 : index
    %c50 = arith.constant 50 : index
    %216 = vector.load %arg9[%c0_174, %c50] : memref<32x64xf32, #tpu.memory_space<vmem>>, vector<32x2xf32>
    %217 = arith.addf %215, %216 : vector<32x2xf32>
    %c0_175 = arith.constant 0 : index
    %c52 = arith.constant 52 : index
    %218 = vector.load %arg9[%c0_175, %c52] : memref<32x64xf32, #tpu.memory_space<vmem>>, vector<32x2xf32>
    %219 = arith.addf %217, %218 : vector<32x2xf32>
    %c0_176 = arith.constant 0 : index
    %c54 = arith.constant 54 : index
    %220 = vector.load %arg9[%c0_176, %c54] : memref<32x64xf32, #tpu.memory_space<vmem>>, vector<32x2xf32>
    %221 = arith.addf %219, %220 : vector<32x2xf32>
    %c0_177 = arith.constant 0 : index
    %c56 = arith.constant 56 : index
    %222 = vector.load %arg9[%c0_177, %c56] : memref<32x64xf32, #tpu.memory_space<vmem>>, vector<32x2xf32>
    %223 = arith.addf %221, %222 : vector<32x2xf32>
    %c0_178 = arith.constant 0 : index
    %c58 = arith.constant 58 : index
    %224 = vector.load %arg9[%c0_178, %c58] : memref<32x64xf32, #tpu.memory_space<vmem>>, vector<32x2xf32>
    %225 = arith.addf %223, %224 : vector<32x2xf32>
    %c0_179 = arith.constant 0 : index
    %c60 = arith.constant 60 : index
    %226 = vector.load %arg9[%c0_179, %c60] : memref<32x64xf32, #tpu.memory_space<vmem>>, vector<32x2xf32>
    %227 = arith.addf %225, %226 : vector<32x2xf32>
    %c0_180 = arith.constant 0 : index
    %c62 = arith.constant 62 : index
    %228 = vector.load %arg9[%c0_180, %c62] : memref<32x64xf32, #tpu.memory_space<vmem>>, vector<32x2xf32>
    %229 = arith.addf %227, %228 : vector<32x2xf32>
    %c3_181 = arith.constant 3 : index
    %c0_182 = arith.constant 0 : index
    %c0_183 = arith.constant 0 : index
    %230 = vector.load %arg5[%c3_181, %c0_182, %c0_183] : memref<4x10x32xf32, #tpu.memory_space<vmem>>, vector<1x10x32xf32>
    %231 = vector.shape_cast %230 : vector<1x10x32xf32> to vector<10x32xf32>
    %cst_184 = arith.constant dense<0.000000e+00> : vector<10x2xf32>
    %232 = tpu.matmul %231, %229, %cst_184 {dimension_numbers = #tpu.dot_dimension_numbers<[1], [0], [0], [1], [0, 0, 1, 1], [], []>} : vector<10x32xf32>, vector<32x2xf32>, vector<10x2xf32> -> vector<10x2xf32>
    %233 = arith.addf %214, %232 : vector<10x2xf32>
    %c0_185 = arith.constant 0 : index
    %c0_186 = arith.constant 0 : index
    %234 = vector.load %arg6[%c0_185, %c0_186] : memref<10x1xf32, #tpu.memory_space<vmem>>, vector<10x1xf32>
    %235 = vector.broadcast %234 : vector<10x1xf32> to vector<10x2xf32>
    %236 = arith.addf %233, %235 : vector<10x2xf32>
    %c0_187 = arith.constant 0 : index
    %c0_188 = arith.constant 0 : index
    %c0_189 = arith.constant 0 : index
    %237 = vector.load %arg7[%c0_187, %c0_188, %c0_189] : memref<1x10x2xf32, #tpu.memory_space<vmem>>, vector<1x10x2xf32>
    %238 = vector.shape_cast %237 : vector<1x10x2xf32> to vector<10x2xf32>
    %239 = vector.shape_cast %236 : vector<10x2xf32> to vector<1x10x2xf32>
    tpu.vector_store %arg7[%c0_187, %c0_188, %c0_189], %239 {strides = array<i32>} : memref<1x10x2xf32, #tpu.memory_space<vmem>>, vector<1x10x2xf32>,
    return
  }
  func.func @transform_0(%arg0: i32) -> (i32, i32, i32) {
    %c0_i32 = arith.constant 0 : i32
    %c0_i32_0 = arith.constant 0 : i32
    %c0_i32_1 = arith.constant 0 : i32
    return %arg0, %c0_i32, %c0_i32_0 : i32, i32, i32
  }
  func.func @transform_1(%arg0: i32) -> (i32, i32) {
    %c0_i32 = arith.constant 0 : i32
    %c0_i32_0 = arith.constant 0 : i32
    %c0_i32_1 = arith.constant 0 : i32
    return %c0_i32, %c0_i32_0 : i32, i32
  }
  func.func @transform_2(%arg0: i32) -> (i32, i32) {
    %c0_i32 = arith.constant 0 : i32
    %c0_i32_0 = arith.constant 0 : i32
    %c0_i32_1 = arith.constant 0 : i32
    return %c0_i32, %c0_i32_0 : i32, i32
  }
  func.func @transform_3(%arg0: i32) -> (i32, i32, i32) {
    %c0_i32 = arith.constant 0 : i32
    %c0_i32_0 = arith.constant 0 : i32
    %c0_i32_1 = arith.constant 0 : i32
    %c0_i32_2 = arith.constant 0 : i32
    return %c0_i32, %c0_i32_0, %c0_i32_1 : i32, i32, i32
  }
  func.func @transform_4(%arg0: i32) -> (i32, i32, i32) {
    %c0_i32 = arith.constant 0 : i32
    %c0_i32_0 = arith.constant 0 : i32
    %c0_i32_1 = arith.constant 0 : i32
    %c0_i32_2 = arith.constant 0 : i32
    return %c0_i32, %c0_i32_0, %c0_i32_1 : i32, i32, i32
  }
  func.func @transform_5(%arg0: i32) -> (i32, i32) {
    %c0_i32 = arith.constant 0 : i32
    %c0_i32_0 = arith.constant 0 : i32
    %c0_i32_1 = arith.constant 0 : i32
    return %c0_i32, %c0_i32_0 : i32, i32
  }
  func.func @transform_6(%arg0: i32) -> (i32, i32, i32) {
    %c0_i32 = arith.constant 0 : i32
    %c0_i32_0 = arith.constant 0 : i32
    %c0_i32_1 = arith.constant 0 : i32
    return %arg0, %c0_i32, %c0_i32_0 : i32, i32, i32
  }
}

</mosaic_0001>

<bundles_post_ra>
// kernel: tpu_custom_call.1
= control target key start
LH: loop header
LB: loop body
LE: loop exit
PB: predicated region body
PF: predicated region fallthrough
CT: control target
= control target key end

     0   :  { %11 = vsyncpa [#allocation5], 0  ;;  %s6043_s0 = inlined_call_operand.hbm [shape: f32[2,256,256], index: 0, kind: input, shape index: {}]   ;;  %s6044_s1 = inlined_call_operand.vmem [shape: f32[32,256], index: 1, kind: input, shape index: {}]   ;;  %s6045_s2 = inlined_call_operand.vmem [shape: f32[32,2], index: 2, kind: input, shape index: {}]   ;;  %s6046_s3 = inlined_call_operand.hbm [shape: f32[16,32,32], index: 3, kind: input, shape index: {}]   ;;  %s6047_s4 = inlined_call_operand.vmem [shape: f32[4,10,32], index: 4, kind: input, shape index: {}]   ;;  %s6048_s5 = inlined_call_operand.vmem [shape: f32[10,1], index: 5, kind: input, shape index: {}]   ;;  %s6049_s6 = inlined_call_operand.vmem [shape: f32[2,10,2], index: 6, kind: output, shape index: {}]  }
   0x1   :  { %13 = vsyncpa [#allocation5 + $0x1], 0 }
   0x2   :  { %14 = vsyncpa [#allocation7], 0  ;;  %s5328_s21 = smov 0   ;;  %s5330_s22 = smov 0  }
   0x3   :  { %s5332_s23 = smov 0   ;;  %s5334_s24 = smov 0  }
   0x4 LB: > { %s5347_s25 = sadd.s32 4294967295, %s5263_s24   ;;  %p40_p0 = scmp.ne.s32.totalorder %s5255_s22, %s5251_s21  ;;  %s5263_s24 = sphi %s5334_s24, %s6064_s24   ;;  %s5259_s23 = sphi %s5332_s23, %s6063_s23   ;;  %s5255_s22 = sphi %s5330_s22, %s6062_s22   ;;  %s5251_s21 = sphi %s5328_s21, %s6061_s21  }
   0x5   : > { %p6050_p1 = scmp.eq.s32.totalorder %s5347_s25, 0  ;;  %p3642_p2 = scmp.ge.s32.totalorder %s5263_s24, 1 }
   0x6   : > { %p182_p3 = scmp.lt.s32.totalorder %s5263_s24, 3  ;;  %s5265_s28 = smov [#allocation6]  }
   0x7   : > { %p5355_p4 = por %p6050_p1, %p40_p0  ;;  %s200_s29 = sshll.u32 %s5265_s28, 4  ;;  %s201_s29 = int_to_ptr.vmem [resolvable:$true] %s200_s29 }
   0x8   : > { %p5359_p5 = pnand %p3642_p2, %p182_p3  ;;  %s5372_s7 = sadd.s32 1, %s5263_s24  }
   0x9   : > { %s6053_s26 = scalar_select %p5355_p4, 1, 0 }
   0xa   : > { %s6054_s27 = scalar_select %p5359_p5, 1, 0 }
   0xb   : > { %p4711_p6 = pneg %p5359_p5  ;;  %s27_s8 = sadd.s32 1, %s5259_s23 }
   0xc   : > { %s24_s9 = ssub.s32 %s5263_s24, %s5372_s7  ;;  %s5167_s12 = scalar_lea.hbm %s6046_s3, 8192 }
   0xd   : > { %p5367_p7 = pnand %p4711_p6, %p6050_p1  ;;  %p5168_p8 = scmp.ne.s32.totalorder %s6046_s3, %s5167_s12 }
   0xe   : > { %p5174_p12 = scmp.lt.u32.totalorder %s5167_s12, %s6046_s3 }
   0xf   : > { %p5169_p9 = pneg %p5367_p7 }
  0x11   : > { %p5170_p10 = pnand %p5169_p9, %p5168_p8 }
  0x13   : > { %p5171_p11 = pneg %p5170_p10 }
  0x15   : > { %p5176_p13 = pnand %p5174_p12, %p5171_p11 }
  0x17   : > { %5179 = shalt.err (!%p5176_p13)
}
  0x18   : > { %s5180_s17 = scalar_lea.vmem %s201_s29, 8192  ;;  %p5188_p6 = scmp.lt.s32.totalorder %s201_s29, %s201_s29 }
  0x19   : > { %p5181_p0 = scmp.ne.s32.totalorder %s201_s29, %s5180_s17  ;;  %p5189_p1 = scmp.lt.s32.totalorder %s5180_s17, %s5180_s17 }
  0x1b   : > { %p5183_p2 = pnand %p5181_p0, %p5169_p9  ;;  %p5190_p4 = por %p5189_p1, %p5188_p6 }
  0x1d   : > { %p5184_p3 = pneg %p5183_p2 }
  0x1f   : > { %p5191_p5 = pnand %p5190_p4, %p5184_p3 }
  0x21   : > { %5194 = shalt.err (!%p5191_p5)
}
  0x22   : > { %s5266_s18 = smov 128   ;;  %s5267_s19 = smov 8  }
  0x23   : > { %4714 = dma.hbm_to_vmem [thread:$0]  (!%p5367_p7), %s6046_s3, 8192, %s201_s29, [#allocation7], %s5266_s18, %s5266_s18, %s5267_s19  }
  0x24   : > { %p25_p8 = scmp.eq.s32.totalorder %s24_s9, 0  ;;  %p34_p9 = scmp.ne.s32.totalorder %s5259_s23, %s5255_s22 }
  0x25   : > { %p35_p1 = scmp.eq.s32.totalorder %s5263_s24, 0  ;;  %p4720_p4 = scmp.lt.s32.totalorder %s5263_s24, 2 }
  0x26   : > { %s5398_s28 = scalar_select %p25_p8, %s5259_s23, %s27_s8  }
  0x27   : > { %p36_p5 = por %p35_p1, %p34_p9  ;;  %s220_s10 = sand.u32 1, %s5259_s23  }
  0x28   : > { %s3645_s11 = sshll.u32 %s220_s10, 9  ;;  %s3753_s12 = sshll.u32 %s5263_s24, 13 }
  0x29   : > { %s5405_s15 = scalar_lea.hbm %s6043_s0, %s3753_s12  ;;  %s224_s29 = scalar_lea.vmem [#allocation4], %s3645_s11 }
  0x2a   : > { %s231_s30 = sshll.u32 %s224_s29, 4  ;;  %p5409_p7 = pnand %p4720_p4, %p36_p5  ;;  %s5407_s30 = int_to_ptr.vmem [resolvable:$true] %s231_s30 }
  0x2b   : > { %s5413_s24 = scalar_lea.sflag [#allocation5], %s220_s10  ;;  %s5195_s9 = scalar_lea.hbm %s5405_s15, 8192 }
  0x2c   : > { %p5196_p10 = scmp.ne.s32.totalorder %s5405_s15, %s5195_s9  ;;  %p5197_p11 = pneg %p5409_p7 }
  0x2d   : > { %s5200_s18 = scalar_lea.hbm %s6043_s0, 16384  ;;  %p5201_p0 = scmp.lt.u32.totalorder %s5405_s15, %s6043_s0 }
  0x2e   : > { %p5198_p12 = pnand %p5197_p11, %p5196_p10  ;;  %p5202_p2 = scmp.lt.u32.totalorder %s5200_s18, %s5195_s9 }
  0x2f   : > { %p5204_p6 = scmp.lt.u32.totalorder %s5195_s9, %s5405_s15 }
  0x30   : > { %p5199_p13 = pneg %p5198_p12  ;;  %p5203_p3 = por %p5202_p2, %p5201_p0 }
  0x32   : > { %p5205_p8 = por %p5204_p6, %p5203_p3 }
  0x34   : > { %p5206_p9 = pnand %p5205_p8, %p5199_p13 }
  0x36   : > { %5209 = shalt.err (!%p5206_p9)
}
  0x37   : > { %s5210_s21 = scalar_lea.vmem %s5407_s30, 8192  ;;  %s5268_s10 = smov [#allocation4]  }
  0x38   : > { %p5211_p1 = scmp.ne.s32.totalorder %s5407_s30, %s5210_s21  ;;  %s5215_s11 = sshll.u32 %s5268_s10, 4  ;;  %s5216_s11 = int_to_ptr.vmem [resolvable:$false] %s5215_s11 }
  0x39   : > { %s5217_s12 = scalar_lea.vmem %s5216_s11, 16384  ;;  %p5218_p10 = scmp.lt.s32.totalorder %s5407_s30, %s5216_s11 }
  0x3a   : > { %p5213_p4 = pnand %p5211_p1, %p5197_p11  ;;  %p5219_p12 = scmp.lt.s32.totalorder %s5217_s12, %s5210_s21 }
  0x3c   : > { %p5214_p5 = pneg %p5213_p4  ;;  %p5220_p0 = por %p5219_p12, %p5218_p10 }
  0x3e   : > { %p5221_p2 = pnand %p5220_p0, %p5214_p5 }
  0x40   : > { %5224 = shalt.err (!%p5221_p2)
}
  0x41   : > { %s5269_s13 = smov 256   ;;  %s5270_s14 = smov 16  }
  0x42   : > { %4718 = dma.hbm_to_vmem [thread:$0]  (!%p5409_p7), %s5405_s15, 8192, %s5407_s30, %s5413_s24, %s5269_s13, %s5269_s13, %s5270_s14  }
  0x43   : > { %p6057_p11 = scmp.ne.s32.totalorder %s6054_s27, 0 }
  0x44   : > { %s245_s29 = sand.u32 (!%p6057_p11), 1, %s5255_s22   ;;  %p6058_p13 = scmp.ne.s32.totalorder (!%p6057_p11), %s6053_s26, 0 }
  0x45   : > { %243 = sbr.rel (%p6057_p11) target bundleno = 1648 (0x670), region = 44  ;;  %s3649_s9 = sshll.u32 (!%p6057_p11), %s245_s29, 9 }
  0x46   : > { %s246_s16 = scalar_lea.sflag (!%p6057_p11), [#allocation5], %s245_s29  ;;  %s5444_s17 = scalar_lea.vmem (!%p6057_p11), [#allocation4], %s3649_s9 }
  0x4c   : > { %5242 = dma.done.wait (%p6058_p13), %s246_s16, 8192  }
  0x4d   : > { %5244 = vsyncadd (%p6058_p13), %s246_s16, 4294959104  ;;  %p6059_p3 = scmp.eq.s32.totalorder %s5347_s25, 0 }
  0x4f   : > { %5246 = dma.done.wait (%p6059_p3), [#allocation7], 8192   ;;  %p6060_p7 = pmov %p6059_p3 }
  0x50   : > { %v315_v0 = vld [vmem:[%s5444_s17 + $0x100] sm:$0xff]  ;;  %v316_v1 = vld [vmem:[%s5444_s17 + $0x110] sm:$0xff]  ;;  %s5271_s26 = smov 64   ;;  %v5478_v32 = vld [vmem:[%s5444_s17 + $0x108] sm:$0xff]  ;;  %vm1091_vm0 = vcmask 130048   ;;  %s5274_s18 = smov 16  }
  0x51   : > { %5248 = vsyncadd (%p6060_p7), [#allocation7], 4294959104  ;;  %v317_v2 = vld [vmem:[%s5444_s17 + $0x120] sm:$0xff]  ;;  %v4781_v3 = vpack.i.bf16 %v316_v1, %v315_v0  ;;  %v318_v4 = vld [vmem:[%s5444_s17 + $0x130] sm:$0xff]  ;;  %v4351_v7 = vpack.c.bf16 %v316_v1, %v315_v0  ;;  %s5275_s19 = smov 124   ;;  %s5276_s20 = smov 122  }
  0x52   : > { %v299_v5 = vld [vmem:[%s5444_s17] sm:$0xff]  ;;  %v300_v6 = vld [vmem:[%s5444_s17 + $0x10] sm:$0xff]  ;;  %v4791_v8 = vpack.i.bf16 %v318_v4, %v317_v2  ;;  %v4355_v9 = vpack.c.bf16 %v318_v4, %v317_v2  ;;  %v5481_v33 = vld [vmem:[%s5444_s17 + $0x118] sm:$0xff]  ;;  %s5277_s21 = smov 120   ;;  %s5278_s10 = smov 118  }
  0x53   : > { %v301_v10 = vld [vmem:[%s5444_s17 + $0x20] sm:$0xff]  ;;  %v302_v11 = vld [vmem:[%s5444_s17 + $0x30] sm:$0xff]  ;;  %v4353_v12 = vpack.c.bf16 %v300_v6, %v299_v5  ;;  %4782 = vrot.lane.b32.xlu0 %v4781_v3, %s5271_s26  ;;  %v4786_v13 = vpack.i.bf16 %v300_v6, %v299_v5  ;;  %4352 = vmatprep.subr.bf16.mxu1 %v4351_v7  ;;  %v5484_v34 = vld [vmem:[%s5444_s17 + $0x8] sm:$0xff]  ;;  %v4415_v40 = vpack.c.bf16 %v5481_v33, %v5478_v32  ;;  %s5279_s11 = smov 116   ;;  %s5280_s12 = smov 114  }
  0x54   : > { %4792 = vrot.lane.b32.xlu1 %v4791_v8, %s5271_s26  ;;  %v4796_v14 = vpack.i.bf16 %v302_v11, %v301_v10  ;;  %v319_v15 = vld [vmem:[%s5444_s17 + $0x140] sm:$0xff]  ;;  %v320_v16 = vld [vmem:[%s5444_s17 + $0x150] sm:$0xff]  ;;  %v4357_v17 = vpack.c.bf16 %v302_v11, %v301_v10  ;;  %v5488_v36 = vld [vmem:[%s5444_s17 + $0x18] sm:$0xff]  ;;  %s5281_s13 = smov 112   ;;  %s5282_s14 = smov 110  }
  0x55   : > { %4354 = vmatpush3.bf16.msra.mxu1 %v4353_v12  ;;  %v303_v18 = vld [vmem:[%s5444_s17 + $0x40] sm:$0xff]  ;;  %v304_v19 = vld [vmem:[%s5444_s17 + $0x50] sm:$0xff]  ;;  %v4359_v20 = vpack.c.bf16 %v320_v16, %v319_v15  ;;  %v4801_v21 = vpack.i.bf16 %v320_v16, %v319_v15  ;;  %v5491_v37 = vld [vmem:[%s5444_s17 + $0x128] sm:$0xff]  ;;  %v4417_v44 = vpack.c.bf16 %v5488_v36, %v5484_v34  ;;  %4416 = vmatprep.subr.bf16.mxu0 %v4415_v40  ;;  %s5283_s29 = smov 108   ;;  %s5284_s9 = smov 106  }
  0x56   : > { %4356 = vmatprep.subr.bf16.mxu1 %v4355_v9  ;;  %v4806_v22 = vpack.i.bf16 %v304_v19, %v303_v18  ;;  %v321_v23 = vld [vmem:[%s5444_s17 + $0x160] sm:$0xff]  ;;  %v322_v24 = vld [vmem:[%s5444_s17 + $0x170] sm:$0xff]  ;;  %v4361_v25 = vpack.c.bf16 %v304_v19, %v303_v18  ;;  %v5494_v38 = vld [vmem:[%s5444_s17 + $0x138] sm:$0xff]  ;;  %v4861_v40 = vpack.i.bf16 %v5481_v33, %v5478_v32  ;;  %s5285_s16 = smov 104   ;;  %s5287_s27 = smov 126  }
  0x57   : > { %4787 = vrot.lane.b32.xlu0 %v4786_v13, %s5271_s26  ;;  %v305_v26 = vld [vmem:[%s5444_s17 + $0x60] sm:$0xff]  ;;  %v306_v27 = vld [vmem:[%s5444_s17 + $0x70] sm:$0xff]  ;;  %v4363_v28 = vpack.c.bf16 %v322_v24, %v321_v23  ;;  %v4811_v31 = vpack.i.bf16 %v322_v24, %v321_v23  ;;  %v4419_v45 = vpack.c.bf16 %v5494_v38, %v5491_v37  ;;  %v5505_v46 = vld [vmem:[%s5444_s17 + $0x28] sm:$0xff]  ;;  %4418 = vmatpush3.bf16.msra.mxu0 %v4417_v44  ;;  %s5288_s15 = smov 100   ;;  %s5289_s30 = smov 98  }
  0x58   : > { %4797 = vrot.lane.b32.xlu1 %v4796_v14, %s5271_s26  ;;  %v323_v29 = vld [vmem:[%s5444_s17 + $0x180] sm:$0xff]  ;;  %v324_v30 = vld [vmem:[%s5444_s17 + $0x190] sm:$0xff]  ;;  %v4816_v35 = vpack.i.bf16 %v306_v27, %v305_v26  ;;  %v4365_v39 = vpack.c.bf16 %v306_v27, %v305_v26  ;;  %v5508_v47 = vld [vmem:[%s5444_s17 + $0x38] sm:$0xff]  ;;  %s5291_s8 = smov 96   ;;  %p282_p6 = scmp.lt.s32.totalorder %s5347_s25, 1 }
  0x59   : > { %4358 = vmatpush3.bf16.msra.mxu1 %v4357_v17  ;;  %v307_v41 = vld [vmem:[%s5444_s17 + $0x80] sm:$0xff]  ;;  %v308_v42 = vld [vmem:[%s5444_s17 + $0x90] sm:$0xff]  ;;  %v4367_v43 = vpack.c.bf16 %v324_v30, %v323_v29  ;;  %v4821_v48 = vpack.i.bf16 %v324_v30, %v323_v29  ;;  %v4421_v50 = vpack.c.bf16 %v5508_v47, %v5505_v46  ;;  %v5517_v53 = vld [vmem:[%s5444_s17 + $0x148] sm:$0xff]  ;;  %4420 = vmatprep.subr.bf16.mxu0 %v4419_v45 }
  0x5a   : > { %4360 = vmatprep.subr.bf16.mxu1 %v4359_v20  ;;  %v325_v49 = vld [vmem:[%s5444_s17 + $0x1a0] sm:$0xff]  ;;  %v4826_v51 = vpack.i.bf16 %v308_v42, %v307_v41  ;;  %v326_v52 = vld [vmem:[%s5444_s17 + $0x1b0] sm:$0xff]  ;;  %v5520_v54 = vld [vmem:[%s5444_s17 + $0x158] sm:$0xff]  ;;  %v4369_v55 = vpack.c.bf16 %v308_v42, %v307_v41  ;;  %v4866_v41 = vpack.i.bf16 %v5488_v36, %v5484_v34  ;;  %s6066_s25 = smov (!%p282_p6, %s5347_s25), 1 }
  0x5b   : > { %4802 = vrot.lane.b32.xlu0 %v4801_v21, %s5271_s26  ;;  %v309_v56 = vld [vmem:[%s5444_s17 + $0xa0] sm:$0xff]  ;;  %v310_v57 = vld [vmem:[%s5444_s17 + $0xb0] sm:$0xff]  ;;  %v4371_v58 = vpack.c.bf16 %v326_v52, %v325_v49  ;;  %v4423_v59 = vpack.c.bf16 %v5520_v54, %v5517_v53  ;;  %v5527_v60 = vld [vmem:[%s5444_s17 + $0x48] sm:$0xff]  ;;  %v4831_v62 = vpack.i.bf16 %v326_v52, %v325_v49  ;;  %4422 = vmatpush3.bf16.msra.mxu0 %v4421_v50 }
  0x5c   : > { %4807 = vrot.lane.b32.xlu1 %v4806_v22, %s5271_s26  ;;  %v5530_v61 = vld [vmem:[%s5444_s17 + $0x58] sm:$0xff]  ;;  %v327_v63 = vld [vmem:[%s5444_s17 + $0x1c0] sm:$0xff]  ;;  %v4836_v1 = vpack.i.bf16 %v310_v57, %v309_v56  ;;  %v328_v2 = vld [vmem:[%s5444_s17 + $0x1d0] sm:$0xff]  ;;  %v4373_v5 = vpack.c.bf16 %v310_v57, %v309_v56  ;;  %v4876_v49 = vpack.i.bf16 %v5508_v47, %v5505_v46  ;;  %v4881_v56 = vpack.i.bf16 %v5520_v54, %v5517_v53 }
  0x5d   : > { %4362 = vmatpush3.bf16.msra.mxu1 %v4361_v25  ;;  %v4425_v0 = vpack.c.bf16 %v5530_v61, %v5527_v60  ;;  %v5539_v3 = vld [vmem:[%s5444_s17 + $0x168] sm:$0xff]  ;;  %v5542_v4 = vld [vmem:[%s5444_s17 + $0x178] sm:$0xff]  ;;  %v311_v6 = vld [vmem:[%s5444_s17 + $0xc0] sm:$0xff]  ;;  %v4375_v8 = vpack.c.bf16 %v328_v2, %v327_v63  ;;  %4424 = vmatprep.subr.bf16.mxu0 %v4423_v59  ;;  %v4841_v13 = vpack.i.bf16 %v328_v2, %v327_v63 }
  0x5e   : > { %4364 = vmatprep.subr.bf16.mxu1 %v4363_v28  ;;  %v312_v7 = vld [vmem:[%s5444_s17 + $0xd0] sm:$0xff]  ;;  %v5549_v9 = vld [vmem:[%s6044_s1 + $0x8] sm:$0xff]  ;;  %v4427_v10 = vpack.c.bf16 %v5542_v4, %v5539_v3  ;;  %v5557_v12 = vld [vmem:[%s5444_s17 + $0x78] sm:$0xff]  ;;  %v4886_v57 = vpack.i.bf16 %v5530_v61, %v5527_v60  ;;  %v4891_v60 = vpack.i.bf16 %v5542_v4, %v5539_v3 }
  0x5f   : > { %4812 = vrot.lane.b32.xlu0 %v4811_v31, %s5271_s26  ;;  %v5554_v11 = vld [vmem:[%s5444_s17 + $0x68] sm:$0xff]  ;;  %415 = vmatprep.mubr.f32.mxu1 %v5549_v9  ;;  %v329_v14 = vld [vmem:[%s5444_s17 + $0x1e0] sm:$0xff]  ;;  %v4846_v16 = vpack.i.bf16 %v312_v7, %v311_v6  ;;  %v330_v17 = vld [vmem:[%s5444_s17 + $0x1f0] sm:$0xff]  ;;  %v4377_v20 = vpack.c.bf16 %v312_v7, %v311_v6 }
  0x60   : > { %4817 = vrot.lane.b32.xlu1 %v4816_v35, %s5271_s26  ;;  %801 = vmatprep.mubr.f32.mxu0 %v5549_v9  ;;  %v4429_v15 = vpack.c.bf16 %v5557_v12, %v5554_v11  ;;  %v5568_v18 = vld [vmem:[%s5444_s17 + $0x188] sm:$0xff]  ;;  %v5571_v19 = vld [vmem:[%s5444_s17 + $0x198] sm:$0xff]  ;;  %v313_v21 = vld [vmem:[%s5444_s17 + $0xe0] sm:$0xff]  ;;  %v4379_v23 = vpack.c.bf16 %v330_v17, %v329_v14  ;;  %v4851_v27 = vpack.i.bf16 %v330_v17, %v329_v14 }
  0x61   : > { %4366 = vmatpush3.bf16.msra.mxu1 %v4365_v39  ;;  %4426 = vmatpush3.bf16.msra.mxu0 %v4425_v0  ;;  %v314_v22 = vld [vmem:[%s5444_s17 + $0xf0] sm:$0xff]  ;;  %v4431_v24 = vpack.c.bf16 %v5571_v19, %v5568_v18  ;;  %v5578_v25 = vld [vmem:[%s5444_s17 + $0x88] sm:$0xff]  ;;  %v5581_v26 = vld [vmem:[%s5444_s17 + $0x98] sm:$0xff]  ;;  %v4896_v61 = vpack.i.bf16 %v5557_v12, %v5554_v11  ;;  %v4901_v0 = vpack.i.bf16 %v5571_v19, %v5568_v18 }
  0x62   : > { %4368 = vmatprep.subr.bf16.mxu1 %v4367_v43  ;;  %4428 = vmatprep.subr.bf16.mxu0 %v4427_v10  ;;  %v4433_v28 = vpack.c.bf16 %v5581_v26, %v5578_v25  ;;  %v4856_v29 = vpack.i.bf16 %v314_v22, %v313_v21  ;;  %v5588_v30 = vld [vmem:[%s5444_s17 + $0x1a8] sm:$0xff]  ;;  %v5591_v31 = vld [vmem:[%s5444_s17 + $0x1b8] sm:$0xff]  ;;  %v4381_v35 = vpack.c.bf16 %v314_v22, %v313_v21  ;;  %v5608_v44 = vld [vmem:[%s6044_s1] sm:$0xff]  ;;  %v5272_v10 = vmov 0  }
  0x63   : > { %4822 = vrot.lane.b32.xlu0 %v4821_v48, %s5271_s26  ;;  %v4435_v39 = vpack.c.bf16 %v5591_v31, %v5588_v30  ;;  %v5602_v42 = vld [vmem:[%s5444_s17 + $0xa8] sm:$0xff]  ;;  %v716_v43 = vld [vmem:[%s5444_s17 + $0xb8] sm:$0xff]  ;;  %v4871_v48 = vpack.i.bf16 %v5494_v38, %v5491_v37  ;;  %v5634_v52 = vld [vmem:[%s6044_s1 + $0x10] sm:$0xff]  ;;  %v4911_v2 = vpack.i.bf16 %v5591_v31, %v5588_v30  ;;  %4942 = vset.pattern.permute.xlu1 %v5272_v10 }
  0x64   : > { %4827 = vrot.lane.b32.xlu1 %v4826_v51, %s5271_s26  ;;  %v5611_v45 = vld [vmem:[%s5444_s17 + $0x1c8] sm:$0xff]  ;;  %v734_v32 = vld [vmem:[%s5444_s17 + $0x1d8] sm:$0xff]  ;;  %v4437_v34 = vpack.c.bf16 %v716_v43, %v5602_v42  ;;  %v5674_v63 = vld [vmem:[%s6044_s1 + $0x30] sm:$0xff]  ;;  %v4916_v3 = vpack.i.bf16 %v716_v43, %v5602_v42  ;;  %4941 = vset.pattern.permute.xlu0 %v5272_v10 }
  0x65   : > { %4370 = vmatpush3.bf16.msra.mxu1 %v4369_v55  ;;  %4430 = vmatpush3.bf16.msra.mxu0 %v4429_v15  ;;  %v5617_v33 = vld [vmem:[%s6044_s1 + $0x18] sm:$0xff]  ;;  %v4439_v36 = vpack.c.bf16 %v734_v32, %v5611_v45  ;;  %v717_v50 = vld [vmem:[%s5444_s17 + $0xc8] sm:$0xff]  ;;  %v4921_v4 = vpack.i.bf16 %v734_v32, %v5611_v45 }
  0x66   : > { %4372 = vmatprep.subr.bf16.mxu1 %v4371_v58  ;;  %4432 = vmatprep.subr.bf16.mxu0 %v4431_v24  ;;  %v718_v51 = vld [vmem:[%s5444_s17 + $0xd8] sm:$0xff]  ;;  %v735_v55 = vld [vmem:[%s5444_s17 + $0x1e8] sm:$0xff] }
  0x67   : > { %4832 = vrot.lane.b32.xlu0 %v4831_v62, %s5271_s26  ;;  %v736_v37 = vld [vmem:[%s5444_s17 + $0x1f8] sm:$0xff]  ;;  %v5641_v38 = vld [vmem:[%s6044_s1 + $0x28] sm:$0xff]  ;;  %v4441_v46 = vpack.c.bf16 %v718_v51, %v717_v50  ;;  %v5656_v62 = vld [vmem:[%s6044_s1 + $0x20] sm:$0xff] }
  0x68   : > { %4837 = vrot.lane.b32.xlu1 %v4836_v1, %s5271_s26  ;;  %v4443_v47 = vpack.c.bf16 %v736_v37, %v735_v55  ;;  %v719_v58 = vld [vmem:[%s5444_s17 + $0xe8] sm:$0xff]  ;;  %v720_v59 = vld [vmem:[%s5444_s17 + $0xf8] sm:$0xff]  ;;  %v4906_v1 = vpack.i.bf16 %v5581_v26, %v5578_v25  ;;  %v4931_v6 = vpack.i.bf16 %v736_v37, %v735_v55  ;;  %s5286_s17 = smov 102  }
  0x69   : > { %4374 = vmatpush3.bf16.msra.mxu1 %v4373_v5  ;;  %4434 = vmatpush3.bf16.msra.mxu0 %v4433_v28  ;;  %v5661_v53 = vld [vmem:[%s6044_s1 + $0x38] sm:$0xff]  ;;  %v4445_v54 = vpack.c.bf16 %v720_v59, %v719_v58  ;;  %v4926_v5 = vpack.i.bf16 %v718_v51, %v717_v50  ;;  %v4936_v7 = vpack.i.bf16 %v720_v59, %v719_v58  ;;  %v5714_v11 = vld [vmem:[%s6045_s2 + $0x8] sm:$0xff] }
  0x6a   : > { %4376 = vmatprep.subr.bf16.mxu1 %v4375_v8  ;;  %4436 = vmatprep.subr.bf16.mxu0 %v4435_v39  ;;  %v5706_v8 = vld [vmem:[%s6045_s2] sm:$0xff]  ;;  %v5719_v12 = vld [vmem:[%s6045_s2 + $0x18] sm:$0xff] }
  0x6b   : > { %4842 = vrot.lane.b32.xlu0 %v4841_v13, %s5271_s26  ;;  %v5726_v13 = vld [vmem:[%s6045_s2 + $0x10] sm:$0xff] }
  0x6c   : > { %4847 = vrot.lane.b32.xlu1 %v4846_v16, %s5271_s26 }
  0x6d   : > { %4378 = vmatpush3.bf16.msra.mxu1 %v4377_v20  ;;  %4438 = vmatpush3.bf16.msra.mxu0 %v4437_v34 }
  0x6e   : > { %4380 = vmatprep.subr.bf16.mxu1 %v4379_v23  ;;  %4440 = vmatprep.subr.bf16.mxu0 %v4439_v36 }
  0x6f   : > { %4852 = vrot.lane.b32.xlu0 %v4851_v27, %s5271_s26 }
  0x70   : > { %4857 = vrot.lane.b32.xlu1 %v4856_v29, %s5271_s26 }
  0x71   : > { %4382 = vmatpush3.bf16.msra.mxu1 %v4381_v35  ;;  %4442 = vmatpush3.bf16.msra.mxu0 %v4441_v46 }
  0x72   : > { %4444 = vmatprep.subr.bf16.mxu0 %v4443_v47 }
  0x73   : > { %4862 = vrot.lane.b32.xlu0 %v4861_v40, %s5271_s26 }
  0x74   : > { %416 = vmatmul.mubr.f32.vlgmr.msra.gmra.mrb[0].mxu1 %v5608_v44  ;;  %4867 = vrot.lane.b32.xlu1 %v4866_v41, %s5271_s26 }
  0x75   : > { %420 = vmatprep.mubr.f32.mxu1 %v5617_v33  ;;  %4446 = vmatpush3.bf16.msra.mxu0 %v4445_v54 }
  0x77   : > { %4872 = vrot.lane.b32.xlu0 %v4871_v48, %s5271_s26 }
  0x78   : > { %421 = vmatmul.mubr.f32.gmra.mrb[2].mxu1 %v5634_v52  ;;  %4877 = vrot.lane.b32.xlu1 %v4876_v49, %s5271_s26 }
  0x79   : > { %425 = vmatprep.mubr.f32.mxu1 %v5641_v38  ;;  %802 = vmatmul.mubr.f32.vlgmr.msra.gmra.mrb[0].mxu0 %v5608_v44 }
  0x7a   : > { %806 = vmatprep.mubr.f32.mxu0 %v5617_v33 }
  0x7b   : > { %4882 = vrot.lane.b32.xlu0 %v4881_v56, %s5271_s26 }
  0x7c   : > { %426 = vmatmul.mubr.f32.gmra.mrb[4].mxu1 %v5656_v62  ;;  %4887 = vrot.lane.b32.xlu1 %v4886_v57, %s5271_s26 }
  0x7d   : > { %430 = vmatprep.mubr.f32.mxu1 %v5661_v53  ;;  %807 = vmatmul.mubr.f32.gmra.mrb[2].mxu0 %v5634_v52 }
  0x7e   : > { %811 = vmatprep.mubr.f32.mxu0 %v5641_v38 }
  0x7f   : > { %4892 = vrot.lane.b32.xlu0 %v4891_v60, %s5271_s26 }
  0x80   : > { %431 = vmatmul.mubr.f32.gmra.mrb[6].mxu1 %v5674_v63  ;;  %4897 = vrot.lane.b32.xlu1 %v4896_v61, %s5271_s26 }
  0x81   : > { %656 = vmatprep.mubr.f32.mxu1 %v5549_v9  ;;  %812 = vmatmul.mubr.f32.gmra.mrb[4].mxu0 %v5656_v62 }
  0x82   : > { %816 = vmatprep.mubr.f32.mxu0 %v5661_v53 }
  0x83   : > { %4902 = vrot.lane.b32.xlu0 %v4901_v0, %s5271_s26 }
  0x84   : > { %4907 = vrot.lane.b32.xlu1 %v4906_v1, %s5271_s26 }
  0x85   : > { %817 = vmatmul.mubr.f32.gmra.mrb[6].mxu0 %v5674_v63 }
  0x87   : > { %4912 = vrot.lane.b32.xlu0 %v4911_v2, %s5271_s26 }
  0x88   : > { %4917 = vrot.lane.b32.xlu1 %v4916_v3, %s5271_s26 }
  0x8b   : > { %4922 = vrot.lane.b32.xlu0 %v4921_v4, %s5271_s26 }
  0x8c   : > { %4927 = vrot.lane.b32.xlu1 %v4926_v5, %s5271_s26 }
  0x8f   : > { %4932 = vrot.lane.b32.xlu0 %v4931_v6, %s5271_s26 }
  0x90   : > { %4937 = vrot.lane.b32.xlu1 %v4936_v7, %s5271_s26  ;;  %s5292_s26 = smov 80  }
  0x93   : > { %333 = vperm.xlu0 %4941, %v5706_v8  }
  0x94   : > { %338 = vperm.xlu1 %4942, %v5714_v11  }
  0x97   : > { %348 = vperm.xlu0 %4941, %v5719_v12  }
  0x98   : > { %343 = vperm.xlu1 %4942, %v5726_v13  }
  0xc5   : > { %v4783_v14 = vpop.permute.xlu0 %4782 }
  0xc6   : > { %v4785_v15 = vunpack.i.h.bf16 %v4783_v14  ;;  %v4784_v16 = vunpack.i.l.bf16 %v4783_v14  ;;  %v4793_v17 = vpop.permute.xlu1 %4792 }
  0xc7   : > { %v4795_v18 = vunpack.i.h.bf16 %v4793_v17  ;;  %v4794_v19 = vunpack.i.l.bf16 %v4793_v17 }
  0xc8   : > { %v4383_v20 = vpack.c.bf16 %v4785_v15, %v4784_v16 }
  0xc9   : > { %v4788_v21 = vpop.permute.xlu0 %4787  ;;  %v4387_v27 = vpack.c.bf16 %v4795_v18, %v4794_v19 }
  0xca   : > { %v4790_v22 = vunpack.i.h.bf16 %v4788_v21  ;;  %v4789_v23 = vunpack.i.l.bf16 %v4788_v21  ;;  %4384 = vmatprep.subr.bf16.mxu1 %v4383_v20  ;;  %v4798_v24 = vpop.permute.xlu1 %4797 }
  0xcb   : > { %v4800_v25 = vunpack.i.h.bf16 %v4798_v24  ;;  %v4799_v26 = vunpack.i.l.bf16 %v4798_v24 }
  0xcc   : > { %v4385_v28 = vpack.c.bf16 %v4790_v22, %v4789_v23 }
  0xcd   : > { %v4803_v29 = vpop.permute.xlu0 %4802  ;;  %v4389_v30 = vpack.c.bf16 %v4800_v25, %v4799_v26 }
  0xce   : > { %4386 = vmatpush3.bf16.msra.mxu1 %v4385_v28  ;;  %v4805_v31 = vunpack.i.h.bf16 %v4803_v29  ;;  %v4804_v35 = vunpack.i.l.bf16 %v4803_v29  ;;  %v4808_v39 = vpop.permute.xlu1 %4807 }
  0xcf   : > { %4388 = vmatprep.subr.bf16.mxu1 %v4387_v27  ;;  %v4810_v40 = vunpack.i.h.bf16 %v4808_v39  ;;  %v4809_v41 = vunpack.i.l.bf16 %v4808_v39 }
  0xd0   : > { %v4391_v42 = vpack.c.bf16 %v4805_v31, %v4804_v35 }
  0xd1   : > { %v4813_v43 = vpop.permute.xlu0 %4812  ;;  %v4393_v45 = vpack.c.bf16 %v4810_v40, %v4809_v41 }
  0xd2   : > { %4390 = vmatpush3.bf16.msra.mxu1 %v4389_v30  ;;  %v4815_v32 = vunpack.i.h.bf16 %v4813_v43  ;;  %v4814_v34 = vunpack.i.l.bf16 %v4813_v43  ;;  %v4818_v36 = vpop.permute.xlu1 %4817 }
  0xd3   : > { %v4820_v48 = vunpack.i.h.bf16 %v4818_v36  ;;  %v4819_v49 = vunpack.i.l.bf16 %v4818_v36  ;;  %4392 = vmatprep.subr.bf16.mxu1 %v4391_v42 }
  0xd4   : > { %v4395_v50 = vpack.c.bf16 %v4815_v32, %v4814_v34 }
  0xd5   : > { %v4823_v51 = vpop.permute.xlu0 %4822  ;;  %v4397_v55 = vpack.c.bf16 %v4820_v48, %v4819_v49 }
  0xd6   : > { %4394 = vmatpush3.bf16.msra.mxu1 %v4393_v45  ;;  %v4825_v37 = vunpack.i.h.bf16 %v4823_v51  ;;  %v4824_v46 = vunpack.i.l.bf16 %v4823_v51  ;;  %v4828_v47 = vpop.permute.xlu1 %4827 }
  0xd7   : > { %v4830_v56 = vunpack.i.h.bf16 %v4828_v47  ;;  %v4829_v57 = vunpack.i.l.bf16 %v4828_v47  ;;  %4396 = vmatprep.subr.bf16.mxu1 %v4395_v50 }
  0xd8   : > { %v4399_v58 = vpack.c.bf16 %v4825_v37, %v4824_v46 }
  0xd9   : > { %v4833_v59 = vpop.permute.xlu0 %4832  ;;  %v4401_v54 = vpack.c.bf16 %v4830_v56, %v4829_v57 }
  0xda   : > { %4398 = vmatpush3.bf16.msra.mxu1 %v4397_v55  ;;  %v4835_v60 = vunpack.i.h.bf16 %v4833_v59  ;;  %v4834_v61 = vunpack.i.l.bf16 %v4833_v59  ;;  %v4838_v0 = vpop.permute.xlu1 %4837 }
  0xdb   : > { %v4840_v1 = vunpack.i.h.bf16 %v4838_v0  ;;  %v4839_v2 = vunpack.i.l.bf16 %v4838_v0  ;;  %4400 = vmatprep.subr.bf16.mxu1 %v4399_v58 }
  0xdc   : > { %v4403_v3 = vpack.c.bf16 %v4835_v60, %v4834_v61 }
  0xdd   : > { %v4843_v4 = vpop.permute.xlu0 %4842  ;;  %v4405_v5 = vpack.c.bf16 %v4840_v1, %v4839_v2 }
  0xde   : > { %4402 = vmatpush3.bf16.msra.mxu1 %v4401_v54  ;;  %v4845_v6 = vunpack.i.h.bf16 %v4843_v4  ;;  %v4844_v7 = vunpack.i.l.bf16 %v4843_v4  ;;  %v4848_v14 = vpop.permute.xlu1 %4847 }
  0xdf   : > { %v4850_v15 = vunpack.i.h.bf16 %v4848_v14  ;;  %v4849_v16 = vunpack.i.l.bf16 %v4848_v14  ;;  %4404 = vmatprep.subr.bf16.mxu1 %v4403_v3 }
  0xe0   : > { %v4407_v17 = vpack.c.bf16 %v4845_v6, %v4844_v7 }
  0xe1   : > { %v4853_v18 = vpop.permute.xlu0 %4852  ;;  %v4409_v19 = vpack.c.bf16 %v4850_v15, %v4849_v16 }
  0xe2   : > { %4406 = vmatpush3.bf16.msra.mxu1 %v4405_v5  ;;  %v4855_v20 = vunpack.i.h.bf16 %v4853_v18  ;;  %v4854_v21 = vunpack.i.l.bf16 %v4853_v18  ;;  %v4858_v22 = vpop.permute.xlu1 %4857 }
  0xe3   : > { %v4860_v23 = vunpack.i.h.bf16 %v4858_v22  ;;  %v4859_v24 = vunpack.i.l.bf16 %v4858_v22  ;;  %4408 = vmatprep.subr.bf16.mxu1 %v4407_v17 }
  0xe4   : > { %v4411_v25 = vpack.c.bf16 %v4855_v20, %v4854_v21 }
  0xe5   : > { %v4863_v26 = vpop.permute.xlu0 %4862  ;;  %v4413_v27 = vpack.c.bf16 %v4860_v23, %v4859_v24 }
  0xe6   : > { %4410 = vmatpush3.bf16.msra.mxu1 %v4409_v19  ;;  %v4865_v28 = vunpack.i.h.bf16 %v4863_v26  ;;  %v4864_v29 = vunpack.i.l.bf16 %v4863_v26  ;;  %v4868_v30 = vpop.permute.xlu1 %4867 }
  0xe7   : > { %v4870_v31 = vunpack.i.h.bf16 %v4868_v30  ;;  %v4869_v35 = vunpack.i.l.bf16 %v4868_v30  ;;  %4412 = vmatprep.subr.bf16.mxu1 %v4411_v25 }
  0xe8   : > { %v4447_v39 = vpack.c.bf16 %v4865_v28, %v4864_v29 }
  0xe9   : > { %v4873_v40 = vpop.permute.xlu0 %4872  ;;  %v4449_v41 = vpack.c.bf16 %v4870_v31, %v4869_v35 }
  0xea   : > { %4414 = vmatpush3.bf16.msra.mxu1 %v4413_v27  ;;  %v4875_v42 = vunpack.i.h.bf16 %v4873_v40  ;;  %v4874_v43 = vunpack.i.l.bf16 %v4873_v40  ;;  %v4878_v45 = vpop.permute.xlu1 %4877 }
  0xeb   : > { %v4880_v32 = vunpack.i.h.bf16 %v4878_v45  ;;  %v4879_v34 = vunpack.i.l.bf16 %v4878_v45  ;;  %4448 = vmatprep.subr.bf16.mxu1 %v4447_v39 }
  0xec   : > { %v4451_v36 = vpack.c.bf16 %v4875_v42, %v4874_v43 }
  0xed   : > { %657 = vmatmul.mubr.f32.vlgmr.msra.gmra.mrb[8].mxu1 %v5608_v44  ;;  %v4883_v48 = vpop.permute.xlu0 %4882  ;;  %v4453_v49 = vpack.c.bf16 %v4880_v32, %v4879_v34 }
  0xee   : > { %4450 = vmatpush3.bf16.msra.mxu1 %v4449_v41  ;;  %v4885_v50 = vunpack.i.h.bf16 %v4883_v48  ;;  %v4884_v51 = vunpack.i.l.bf16 %v4883_v48  ;;  %661 = vmatprep.mubr.f32.mxu1 %v5617_v33  ;;  %v4888_v55 = vpop.permute.xlu1 %4887 }
  0xef   : > { %v4890_v37 = vunpack.i.h.bf16 %v4888_v55  ;;  %v4889_v46 = vunpack.i.l.bf16 %v4888_v55  ;;  %4452 = vmatprep.subr.bf16.mxu1 %v4451_v36 }
  0xf0   : > { %v4455_v47 = vpack.c.bf16 %v4885_v50, %v4884_v51 }
  0xf1   : > { %662 = vmatmul.mubr.f32.gmra.mrb[10].mxu1 %v5634_v52  ;;  %v4893_v56 = vpop.permute.xlu0 %4892  ;;  %v4457_v57 = vpack.c.bf16 %v4890_v37, %v4889_v46 }
  0xf2   : > { %4454 = vmatpush3.bf16.msra.mxu1 %v4453_v49  ;;  %v4895_v58 = vunpack.i.h.bf16 %v4893_v56  ;;  %v4894_v59 = vunpack.i.l.bf16 %v4893_v56  ;;  %666 = vmatprep.mubr.f32.mxu1 %v5641_v38  ;;  %v4898_v54 = vpop.permute.xlu1 %4897 }
  0xf3   : > { %v4900_v60 = vunpack.i.h.bf16 %v4898_v54  ;;  %v4899_v61 = vunpack.i.l.bf16 %v4898_v54  ;;  %4456 = vmatprep.subr.bf16.mxu1 %v4455_v47 }
  0xf4   : > { %v4459_v0 = vpack.c.bf16 %v4895_v58, %v4894_v59 }
  0xf5   : > { %667 = vmatmul.mubr.f32.gmra.mrb[12].mxu1 %v5656_v62  ;;  %v4903_v1 = vpop.permute.xlu0 %4902  ;;  %v4461_v2 = vpack.c.bf16 %v4900_v60, %v4899_v61  ;;  %v5273_v61 = vmov 0.0  }
  0xf6   : > { %4458 = vmatpush3.bf16.msra.mxu1 %v4457_v57  ;;  %v4905_v3 = vunpack.i.h.bf16 %v4903_v1  ;;  %v4904_v4 = vunpack.i.l.bf16 %v4903_v1  ;;  %671 = vmatprep.mubr.f32.mxu1 %v5661_v53  ;;  %v4908_v5 = vpop.permute.xlu1 %4907  ;;  %1092 = vst.msk [vmem:[#allocation2] sm:$0xff] %vm1091_vm0, %v5273_v61  ;;  %1093 = vst.msk [vmem:[#allocation2 + $0x8] sm:$0xff] %vm1091_vm0, %v5273_v61 }
  0xf7   : > { %v4910_v6 = vunpack.i.h.bf16 %v4908_v5  ;;  %v4909_v7 = vunpack.i.l.bf16 %v4908_v5  ;;  %4460 = vmatprep.subr.bf16.mxu1 %v4459_v0  ;;  %1094 = vst.msk [vmem:[#allocation2 + $0x10] sm:$0xff] %vm1091_vm0, %v5273_v61  ;;  %1095 = vst.msk [vmem:[#allocation2 + $0x18] sm:$0xff] %vm1091_vm0, %v5273_v61 }
  0xf8   : > { %v4463_v14 = vpack.c.bf16 %v4905_v3, %v4904_v4 }
  0xf9   : > { %672 = vmatmul.mubr.f32.gmra.mrb[14].mxu1 %v5674_v63  ;;  %v4913_v15 = vpop.permute.xlu0 %4912  ;;  %v4465_v16 = vpack.c.bf16 %v4910_v6, %v4909_v7 }
  0xfa   : > { %4462 = vmatpush3.bf16.msra.mxu1 %v4461_v2  ;;  %v4915_v17 = vunpack.i.h.bf16 %v4913_v15  ;;  %v4914_v18 = vunpack.i.l.bf16 %v4913_v15  ;;  %v4918_v19 = vpop.permute.xlu1 %4917  ;;  %1042 = vmatprep.mubr.f32.mxu1 %v5549_v9 }
  0xfb   : > { %v4920_v20 = vunpack.i.h.bf16 %v4918_v19  ;;  %v4919_v21 = vunpack.i.l.bf16 %v4918_v19  ;;  %4464 = vmatprep.subr.bf16.mxu1 %v4463_v14 }
  0xfc   : > { %v4467_v22 = vpack.c.bf16 %v4915_v17, %v4914_v18 }
  0xfd   : > { %v4923_v23 = vpop.permute.xlu0 %4922  ;;  %v4469_v24 = vpack.c.bf16 %v4920_v20, %v4919_v21 }
  0xfe   : > { %4466 = vmatpush3.bf16.msra.mxu1 %v4465_v16  ;;  %v4925_v25 = vunpack.i.h.bf16 %v4923_v23  ;;  %v4924_v26 = vunpack.i.l.bf16 %v4923_v23  ;;  %v4928_v27 = vpop.permute.xlu1 %4927 }
  0xff   : > { %v4930_v28 = vunpack.i.h.bf16 %v4928_v27  ;;  %v4929_v29 = vunpack.i.l.bf16 %v4928_v27  ;;  %4468 = vmatprep.subr.bf16.mxu1 %v4467_v22 }
 0x100   : > { %v4471_v30 = vpack.c.bf16 %v4925_v25, %v4924_v26 }
 0x101   : > { %v4933_v31 = vpop.permute.xlu0 %4932  ;;  %v4473_v35 = vpack.c.bf16 %v4930_v28, %v4929_v29 }
 0x102   : > { %4470 = vmatpush3.bf16.msra.mxu1 %v4469_v24  ;;  %v4935_v39 = vunpack.i.h.bf16 %v4933_v31  ;;  %v4934_v40 = vunpack.i.l.bf16 %v4933_v31  ;;  %v4938_v9 = vpop.permute.xlu1 %4937 }
 0x103   : > { %v4940_v41 = vunpack.i.h.bf16 %v4938_v9  ;;  %v4939_v42 = vunpack.i.l.bf16 %v4938_v9  ;;  %4472 = vmatprep.subr.bf16.mxu1 %v4471_v30 }
 0x104   : > { %v4475_v43 = vpack.c.bf16 %v4935_v39, %v4934_v40 }
 0x105   : > { %v4477_v45 = vpack.c.bf16 %v4940_v41, %v4939_v42 }
 0x106   : > { %4474 = vmatpush3.bf16.msra.mxu1 %v4473_v35 }
 0x107   : > { %4476 = vmatprep.subr.bf16.mxu1 %v4475_v43 }
 0x10a   : > { %4478 = vmatpush3.bf16.msra.mxu1 %v4477_v45 }
 0x10d   : > { %1043 = vmatmul.mubr.f32.vlgmr.msra.gmra.mrb[16].mxu1 %v5608_v44 }
 0x10e   : > { %1047 = vmatprep.mubr.f32.mxu1 %v5617_v33 }
 0x111   : > { %1048 = vmatmul.mubr.f32.gmra.mrb[18].mxu1 %v5634_v52 }
 0x112   : > { %1052 = vmatprep.mubr.f32.mxu1 %v5641_v38  ;;  %v5748_v0 = vpop.permute.xlu0 %333 }
 0x113   : > { %v5750_v1 = vpop.permute.xlu1 %338 }
 0x115   : > { %1053 = vmatmul.mubr.f32.gmra.mrb[20].mxu1 %v5656_v62 }
 0x116   : > { %1057 = vmatprep.mubr.f32.mxu1 %v5661_v53  ;;  %v5772_v19 = vpop.permute.xlu0 %348 }
 0x117   : > { %v5762_v6 = vpop.permute.xlu1 %343 }
 0x119   : > { %1058 = vmatmul.mubr.f32.gmra.mrb[22].mxu1 %v5674_v63 }
 0x147   : > { %v3787_v32 = vpop.f32.mrb[0].mxu1 }
 0x148   : > { %v3788_v34 = vpop.f32.mrb[1].mxu1 }
 0x149   : > { %v3789_v36 = vadd.f32 %v3788_v34, %v3787_v32 }
 0x14b   : > { %v3790_v48 = vpop.f32.mrb[2].mxu1  ;;  %v5753_v2 = vadd.f32 %v3789_v36, %v5748_v0 }
 0x14c   : > { %v3791_v49 = vpop.f32.mrb[3].mxu1  ;;  %v3875_v46 = vpop.f32.mrb[0].mxu0 }
 0x14d   : > { %v3792_v50 = vadd.f32 %v3791_v49, %v3790_v48  ;;  %v3876_v38 = vpop.f32.mrb[1].mxu0  ;;  %v440_v5 = vmin.f32 %v5753_v2, 0.0  ;;  %vm436_vm1 = vcmp.gt.f32.partialorder %v5753_v2, 0.0 }
 0x14e   : > { %v3877_v47 = vadd.f32 %v3876_v38, %v3875_v46 }
 0x14f   : > { %v3793_v51 = vpop.f32.mrb[4].mxu1  ;;  %v5759_v4 = vadd.f32 %v3792_v50, %v5750_v1  ;;  %v444_v18 = vmul.f32 1.442695, %v440_v5 }
 0x150   : > { %v3794_v44 = vpop.f32.mrb[5].mxu1  ;;  %v3878_v62 = vpop.f32.mrb[2].mxu0  ;;  %v5756_v3 = vadd.f32 %v3877_v47, %v5748_v0 }
 0x151   : > { %v3795_v55 = vadd.f32 %v3794_v44, %v3793_v51  ;;  %v3879_v56 = vpop.f32.mrb[3].mxu0  ;;  %v441_v15 = vmin.f32 %v5759_v4, 0.0  ;;  %5127 = vpow2.f32 %v444_v18  ;;  %vm437_vm4 = vcmp.gt.f32.partialorder %v5759_v4, 0.0 }
 0x152   : > { %v3880_v53 = vadd.f32 %v3879_v56, %v3878_v62  ;;  %v826_v14 = vmin.f32 %v5756_v3, 0.0  ;;  %vm822_vm2 = vcmp.gt.f32.partialorder %v5756_v3, 0.0 }
 0x153   : > { %v3796_v33 = vpop.f32.mrb[6].mxu1  ;;  %v5770_v16 = vadd.f32 %v3795_v55, %v5762_v6  ;;  %v446_v25 = vmul.f32 1.442695, %v441_v15 }
 0x154   : > { %v3797_v37 = vpop.f32.mrb[7].mxu1  ;;  %v3881_v57 = vpop.f32.mrb[4].mxu0  ;;  %v5765_v7 = vadd.f32 %v3880_v53, %v5750_v1  ;;  %v830_v24 = vmul.f32 1.442695, %v826_v14 }
 0x155   : > { %v3798_v52 = vadd.f32 %v3797_v37, %v3796_v33  ;;  %v3882_v63 = vpop.f32.mrb[5].mxu0  ;;  %v442_v26 = vmin.f32 %v5770_v16, 0.0  ;;  %vm438_vm7 = vcmp.gt.f32.partialorder %v5770_v16, 0.0 }
 0x156   : > { %v3883_v58 = vadd.f32 %v3882_v63, %v3881_v57  ;;  %v827_v21 = vmin.f32 %v5765_v7, 0.0  ;;  %5129 = vpow2.f32 %v830_v24  ;;  %vm823_vm6 = vcmp.gt.f32.partialorder %v5765_v7, 0.0 }
 0x157   : > { %v5780_v27 = vadd.f32 %v3798_v52, %v5772_v19  ;;  %5131 = vpow2.f32 %v446_v25  ;;  %v448_v41 = vmul.f32 1.442695, %v442_v26 }
 0x158   : > { %v3884_v59 = vpop.f32.mrb[6].mxu0  ;;  %v5776_v22 = vadd.f32 %v3883_v58, %v5762_v6  ;;  %v832_v31 = vmul.f32 1.442695, %v827_v21 }
 0x159   : > { %v3885_v54 = vpop.f32.mrb[7].mxu0  ;;  %v443_v42 = vmin.f32 %v5780_v27, 0.0  ;;  %vm439_vm10 = vcmp.gt.f32.partialorder %v5780_v27, 0.0 }
 0x15a   : > { %v3886_v60 = vadd.f32 %v3885_v54, %v3884_v59  ;;  %v828_v35 = vmin.f32 %v5776_v22, 0.0  ;;  %5133 = vpow2.f32 %v832_v31  ;;  %vm824_vm9 = vcmp.gt.f32.partialorder %v5776_v22, 0.0 }
 0x15b   : > { %v450_v51 = vmul.f32 1.442695, %v443_v42  ;;  %v5128_v47 = vpop.eup %5127 }
 0x15c   : > { %v5785_v39 = vadd.f32 %v3886_v60, %v5772_v19  ;;  %v834_v36 = vmul.f32 1.442695, %v828_v35  ;;  %v3653_v58 = vadd.f32 -1.0, %v5128_v47 }
 0x15e   : > { %v829_v48 = vmin.f32 %v5785_v39, 0.0  ;;  %vm825_vm12 = vcmp.gt.f32.partialorder %v5785_v39, 0.0 }
 0x160   : > { %v836_v52 = vmul.f32 1.442695, %v829_v48  ;;  %v5130_v62 = vpop.eup %5129 }
 0x161   : > { %v5132_v57 = vpop.eup %5131  ;;  %v3661_v54 = vadd.f32 -1.0, %v5130_v62 }
 0x162   : > { %v3654_v24 = vadd.f32 -1.0, %v5132_v57 }
 0x164   : > { %v5134_v59 = vpop.eup %5133 }
 0x165   : > { %v3662_v21 = vadd.f32 -1.0, %v5134_v59 }
 0x1c0   : > { %v3831_v17 = vpop.f32.mrb[8].mxu1 }
 0x1c1   : > { %v3832_v20 = vpop.f32.mrb[9].mxu1 }
 0x1c2   : > { %v3833_v23 = vadd.f32 %v3832_v20, %v3831_v17  ;;  %v456_v17 = vsel %vm436_vm1, %v5753_v2, %v3653_v58  ;;  %vm1112_vm1 = vcmask 654464  }
 0x1c4   : > { %v659_v28 = vadd.f32 %v3833_v23, %v5748_v0  ;;  %v3834_v29 = vpop.f32.mrb[10].mxu1  ;;  %v842_v23 = vsel %vm822_vm2, %v5756_v3, %v3661_v54  ;;  %v457_v3 = vsel %vm437_vm4, %v5759_v4, %v3654_v24  ;;  %vm1117_vm2 = vcmask 786048  }
 0x1c5   : > { %v3835_v30 = vpop.f32.mrb[11].mxu1  ;;  %vm3042_vm4 = vcmask 523264  }
 0x1c6   : > { %v681_v40 = vmin.f32 %v659_v28, 0.0  ;;  %v3836_v9 = vadd.f32 %v3835_v30, %v3834_v29  ;;  %vm677_vm3 = vcmp.gt.f32.partialorder %v659_v28, 0.0 }
 0x1c8   : > { %v685_v43 = vmul.f32 1.442695, %v681_v40  ;;  %v664_v45 = vadd.f32 %v3836_v9, %v5750_v1  ;;  %v3837_v32 = vpop.f32.mrb[12].mxu1  ;;  %v843_v9 = vsel %vm823_vm6, %v5765_v7, %v3662_v21 }
 0x1c9   : > { %v3838_v34 = vpop.f32.mrb[13].mxu1 }
 0x1ca   : > { %5135 = vpow2.f32 %v685_v43  ;;  %v682_v49 = vmin.f32 %v664_v45, 0.0  ;;  %v3839_v50 = vadd.f32 %v3838_v34, %v3837_v32  ;;  %vm678_vm5 = vcmp.gt.f32.partialorder %v664_v45, 0.0 }
 0x1cb   : > { %5137 = vpow2.f32 %v448_v41 }
 0x1cc   : > { %v687_v44 = vmul.f32 1.442695, %v682_v49  ;;  %v669_v55 = vadd.f32 %v3839_v50, %v5762_v6  ;;  %v3840_v33 = vpop.f32.mrb[14].mxu1  ;;  %5139 = vpow2.f32 %v834_v36 }
 0x1cd   : > { %v3841_v37 = vpop.f32.mrb[15].mxu1 }
 0x1ce   : > { %5141 = vpow2.f32 %v687_v44  ;;  %v683_v46 = vmin.f32 %v669_v55, 0.0  ;;  %v3842_v38 = vadd.f32 %v3841_v37, %v3840_v33  ;;  %vm679_vm8 = vcmp.gt.f32.partialorder %v669_v55, 0.0 }
 0x1cf   : > { %5143 = vpow2.f32 %v450_v51 }
 0x1d0   : > { %v689_v56 = vmul.f32 1.442695, %v683_v46  ;;  %v674_v53 = vadd.f32 %v3842_v38, %v5772_v19  ;;  %5145 = vpow2.f32 %v836_v52 }
 0x1d2   : > { %5147 = vpow2.f32 %v689_v56  ;;  %v684_v63 = vmin.f32 %v674_v53, 0.0  ;;  %vm680_vm11 = vcmp.gt.f32.partialorder %v674_v53, 0.0 }
 0x1d4   : > { %v5136_v60 = vpop.eup %5135  ;;  %v691_v5 = vmul.f32 1.442695, %v684_v63 }
 0x1d5   : > { %v3657_v14 = vadd.f32 -1.0, %v5136_v60  ;;  %v5138_v15 = vpop.eup %5137 }
 0x1d6   : > { %5149 = vpow2.f32 %v691_v5  ;;  %v5140_v18 = vpop.eup %5139  ;;  %v3655_v2 = vadd.f32 -1.0, %v5138_v15 }
 0x1d7   : > { %v697_v20 = vsel %vm677_vm3, %v659_v28, %v3657_v14  ;;  %v3663_v40 = vadd.f32 -1.0, %v5140_v18  ;;  %vm1151_vm3 = vcmask 261120  }
 0x1d8   : > { %v5142_v25 = vpop.eup %5141  ;;  %v701_v26 = vadd.f32 %v697_v20, %v456_v17  ;;  %v458_v34 = vsel %vm438_vm7, %v5770_v16, %v3655_v2 }
 0x1d9   : > { %v3658_v29 = vadd.f32 -1.0, %v5142_v25  ;;  %v5144_v30 = vpop.eup %5143  ;;  %v844_v49 = vsel %vm824_vm9, %v5776_v22, %v3663_v40  ;;  %vm3562_vm9 = vcmask 9216  }
 0x1da   : > { %v5799_v31 = vadd.f32 %v842_v23, %v701_v26  ;;  %v5146_v35 = vpop.eup %5145  ;;  %v3656_v50 = vadd.f32 -1.0, %v5144_v30 }
 0x1db   : > { %v698_v28 = vsel %vm678_vm5, %v664_v45, %v3658_v29  ;;  %v3664_v48 = vadd.f32 -1.0, %v5146_v35 }
 0x1dc   : > { %v5148_v41 = vpop.eup %5147  ;;  %v702_v42 = vadd.f32 %v698_v28, %v457_v3  ;;  %v459_v16 = vsel %vm439_vm10, %v5780_v27, %v3656_v50  ;;  %vm3560_vm10 = vcmask 15360  }
 0x1dd   : > { %v3659_v43 = vadd.f32 -1.0, %v5148_v41 }
 0x1de   : > { %v847_v32 = vadd.f32 %v843_v9, %v702_v42 }
 0x1df   : > { %v699_v36 = vsel %vm679_vm8, %v669_v55, %v3659_v43  ;;  %v845_v55 = vsel %vm825_vm12, %v5785_v39, %v3664_v48 }
 0x1e0   : > { %v5150_v45 = vpop.eup %5149  ;;  %v3919_v4 = vpop.f32.mrb[16].mxu1  ;;  %v703_v7 = vadd.f32 %v699_v36, %v458_v34 }
 0x1e1   : > { %v3660_v51 = vadd.f32 -1.0, %v5150_v45  ;;  %v3920_v44 = vpop.f32.mrb[17].mxu1 }
 0x1e2   : > { %v3921_v33 = vadd.f32 %v3920_v44, %v3919_v4  ;;  %v848_v37 = vadd.f32 %v844_v49, %v703_v7  ;;  %v1347_v49 = vld [vmem:[#allocation6 + $0x40] sm:$0xff]  ;;  %v5290_v7 = vmov 1  }
 0x1e3   : > { %v700_v52 = vsel %vm680_vm11, %v674_v53, %v3660_v51  ;;  %4119 = vmatprep.mubr.msk.f32.mxu0 %vm1151_vm3, %v1347_v49  ;;  %v1131_v4 = vld [vmem:[#allocation6 + $0x20] sm:$0xff]  ;;  %5093 = vset.pattern.permute.xlu1 %v5290_v7  ;;  %v1702_v49 = vld [vmem:[#allocation6 + $0xa8] sm:$0xff] }
 0x1e4   : > { %v1045_v22 = vadd.f32 %v3921_v33, %v5748_v0  ;;  %v3922_v46 = vpop.f32.mrb[18].mxu1  ;;  %v704_v38 = vadd.f32 %v700_v52, %v459_v16  ;;  %4091 = vmatprep.mubr.msk.f32.mxu1 %vm1151_vm3, %v1131_v4  ;;  %5094 = vset.pattern.permute.xlu0 %v5290_v7 }
 0x1e5   : > { %v3923_v47 = vpop.f32.mrb[19].mxu1 }
 0x1e6   : > { %v1067_v62 = vmin.f32 %v1045_v22, 0.0  ;;  %v3924_v56 = vadd.f32 %v3923_v47, %v3922_v46  ;;  %v849_v57 = vadd.f32 %v845_v55, %v704_v38  ;;  %vm1063_vm13 = vcmp.gt.f32.partialorder %v1045_v22, 0.0 }
 0x1e8   : > { %v1071_v63 = vmul.f32 1.442695, %v1067_v62  ;;  %v1050_v58 = vadd.f32 %v3924_v56, %v5750_v1  ;;  %v3925_v59 = vpop.f32.mrb[20].mxu1 }
 0x1e9   : > { %v3926_v54 = vpop.f32.mrb[21].mxu1 }
 0x1ea   : > { %5151 = vpow2.f32 %v1071_v63  ;;  %v1068_v60 = vmin.f32 %v1050_v58, 0.0  ;;  %v3927_v53 = vadd.f32 %v3926_v54, %v3925_v59  ;;  %vm1064_vm14 = vcmp.gt.f32.partialorder %v1050_v58, 0.0  ;;  %v1348_v63 = vld [vmem:[#allocation6 + $0x48] sm:$0xff] }
 0x1ec   : > { %v1073_v5 = vmul.f32 1.442695, %v1068_v60  ;;  %v1055_v27 = vadd.f32 %v3927_v53, %v5762_v6  ;;  %v3928_v39 = vpop.f32.mrb[22].mxu1 }
 0x1ed   : > { %v3929_v14 = vpop.f32.mrb[23].mxu1 }
 0x1ee   : > { %5153 = vpow2.f32 %v1073_v5  ;;  %v1069_v0 = vmin.f32 %v1055_v27, 0.0  ;;  %v3930_v15 = vadd.f32 %v3929_v14, %v3928_v39  ;;  %vm1065_vm15 = vcmp.gt.f32.partialorder %v1055_v27, 0.0  ;;  %v1465_v14 = vld [vmem:[#allocation6 + $0x60] sm:$0xff] }
 0x1f0   : > { %v1075_v17 = vmul.f32 1.442695, %v1069_v0  ;;  %v1060_v18 = vadd.f32 %v3930_v15, %v5772_v19  ;;  %v1466_v15 = vld [vmem:[#allocation6 + $0x68] sm:$0xff] }
 0x1f2   : > { %5155 = vpow2.f32 %v1075_v17  ;;  %v1070_v20 = vmin.f32 %v1060_v18, 0.0  ;;  %vm1066_vm0 = vcmp.gt.f32.partialorder %v1060_v18, 0.0 }
 0x1f4   : > { %v5152_v21 = vpop.eup %5151  ;;  %v1077_v1 = vmul.f32 1.442695, %v1070_v20 }
 0x1f5   : > { %v3665_v23 = vadd.f32 -1.0, %v5152_v21  ;;  %v1467_v21 = vld [vmem:[#allocation6 + $0x70] sm:$0xff] }
 0x1f6   : > { %5157 = vpow2.f32 %v1077_v1 }
 0x1f7   : > { %v1083_v24 = vsel %vm1063_vm13, %v1045_v22, %v3665_v23 }
 0x1f8   : > { %v5154_v25 = vpop.eup %5153  ;;  %v1087_v26 = vadd.f32 %v1083_v24, %v5799_v31  ;;  %v1468_v24 = vld [vmem:[#allocation6 + $0x78] sm:$0xff] }
 0x1f9   : > { %v3666_v6 = vadd.f32 -1.0, %v5154_v25 }
 0x1fa   : > { %1100 = vrot.lane.b32.xlu1 %v1087_v26, %s5274_s18 }
 0x1fb   : > { %v1084_v29 = vsel %vm1064_vm14, %v1050_v58, %v3666_v6 }
 0x1fc   : > { %v5156_v30 = vpop.eup %5155  ;;  %v1088_v2 = vadd.f32 %v1084_v29, %v847_v32  ;;  %v1583_v29 = vld [vmem:[#allocation6 + $0x80] sm:$0xff] }
 0x1fd   : > { %v3667_v35 = vadd.f32 -1.0, %v5156_v30 }
 0x1fe   : > { %1102 = vrot.lane.b32.xlu0 %v1088_v2, %s5274_s18  ;;  %v1584_v2 = vld [vmem:[#allocation6 + $0x88] sm:$0xff] }
 0x1ff   : > { %v1085_v19 = vsel %vm1065_vm15, %v1055_v27, %v3667_v35 }
 0x200   : > { %v5158_v28 = vpop.eup %5157  ;;  %v1089_v40 = vadd.f32 %v1085_v19, %v848_v37 }
 0x201   : > { %v3668_v3 = vadd.f32 -1.0, %v5158_v28 }
 0x202   : > { %1104 = vrot.lane.b32.xlu1 %v1089_v40, %s5274_s18  ;;  %v1585_v40 = vld [vmem:[#allocation6 + $0x90] sm:$0xff] }
 0x203   : > { %v1086_v9 = vsel %vm1066_vm0, %v1060_v18, %v3668_v3 }
 0x204   : > { %v1090_v41 = vadd.f32 %v1086_v9, %v849_v57 }
 0x206   : > { %1106 = vrot.lane.b32.xlu0 %v1090_v41, %s5274_s18  ;;  %v1586_v41 = vld [vmem:[#allocation6 + $0x98] sm:$0xff]  ;;  %s3754_s18 = sshll.u32 %s6066_s25, 4 }
 0x26c   : > { %v1101_v31 = vpop.permute.xlu1 %1100 }
 0x26d   : > { %1113 = vst.msk [vmem:[#allocation2] sm:$0xff] %vm1112_vm1, %v1101_v31 }
 0x26e   : > { %1118 = vst.msk [vmem:[#allocation2] sm:$0xff] %vm1117_vm2, %v5273_v61 }
 0x270   : > { %v1103_v42 = vpop.permute.xlu0 %1102 }
 0x271   : > { %1114 = vst.msk [vmem:[#allocation2 + $0x8] sm:$0xff] %vm1112_vm1, %v1103_v42 }
 0x272   : > { %1119 = vst.msk [vmem:[#allocation2 + $0x8] sm:$0xff] %vm1117_vm2, %v5273_v61 }
 0x274   : > { %v1105_v43 = vpop.permute.xlu1 %1104 }
 0x275   : > { %1115 = vst.msk [vmem:[#allocation2 + $0x10] sm:$0xff] %vm1112_vm1, %v1105_v43  ;;  %v5818_v32 = vld [vmem:[#allocation2] sm:$0xff] }
 0x276   : > { %1120 = vst.msk [vmem:[#allocation2 + $0x10] sm:$0xff] %vm1117_vm2, %v5273_v61 }
 0x278   : > { %v1107_v34 = vpop.permute.xlu0 %1106 }
 0x279   : > { %v5820_v36 = vld [vmem:[#allocation2 + $0x8] sm:$0xff]  ;;  %1116 = vst.msk [vmem:[#allocation2 + $0x18] sm:$0xff] %vm1112_vm1, %v1107_v34  ;;  %v1701_v34 = vld [vmem:[#allocation6 + $0xa0] sm:$0xff] }
 0x27a   : > { %1121 = vst.msk [vmem:[#allocation2 + $0x18] sm:$0xff] %vm1117_vm2, %v5273_v61  ;;  %v4943_v48 = vpack.i.bf16 %v5820_v36, %v5818_v32 }
 0x27c   : > { %4944 = vrot.lane.b32.xlu1 %v4943_v48, %s5275_s19 }
 0x27d   : > { %v5827_v50 = vld [vmem:[#allocation2 + $0x10] sm:$0xff] }
 0x280   : > { %4954 = vrot.lane.b32.xlu1 %v4943_v48, %s5276_s20 }
 0x281   : > { %v5830_v45 = vld [vmem:[#allocation2 + $0x18] sm:$0xff] }
 0x282   : > { %v4948_v61 = vpack.i.bf16 %v5830_v45, %v5827_v50 }
 0x284   : > { %4949 = vrot.lane.b32.xlu0 %v4948_v61, %s5275_s19  ;;  %4964 = vrot.lane.b32.xlu1 %v4943_v48, %s5277_s21 }
 0x288   : > { %4959 = vrot.lane.b32.xlu0 %v4948_v61, %s5276_s20  ;;  %4974 = vrot.lane.b32.xlu1 %v4943_v48, %s5278_s10 }
 0x28c   : > { %4969 = vrot.lane.b32.xlu0 %v4948_v61, %s5277_s21  ;;  %4984 = vrot.lane.b32.xlu1 %v4943_v48, %s5279_s11 }
 0x290   : > { %4979 = vrot.lane.b32.xlu0 %v4948_v61, %s5278_s10  ;;  %4994 = vrot.lane.b32.xlu1 %v4943_v48, %s5280_s12 }
 0x294   : > { %4989 = vrot.lane.b32.xlu0 %v4948_v61, %s5279_s11  ;;  %5004 = vrot.lane.b32.xlu1 %v4943_v48, %s5281_s13 }
 0x298   : > { %4999 = vrot.lane.b32.xlu0 %v4948_v61, %s5280_s12  ;;  %5014 = vrot.lane.b32.xlu1 %v4943_v48, %s5282_s14 }
 0x29c   : > { %5009 = vrot.lane.b32.xlu0 %v4948_v61, %s5281_s13  ;;  %5024 = vrot.lane.b32.xlu1 %v4943_v48, %s5283_s29 }
 0x2a0   : > { %5019 = vrot.lane.b32.xlu0 %v4948_v61, %s5282_s14  ;;  %5034 = vrot.lane.b32.xlu1 %v4943_v48, %s5284_s9 }
 0x2a4   : > { %5029 = vrot.lane.b32.xlu0 %v4948_v61, %s5283_s29  ;;  %5044 = vrot.lane.b32.xlu1 %v4943_v48, %s5285_s16 }
 0x2a8   : > { %5039 = vrot.lane.b32.xlu0 %v4948_v61, %s5284_s9  ;;  %5054 = vrot.lane.b32.xlu1 %v4943_v48, %s5286_s17 }
 0x2ac   : > { %5049 = vrot.lane.b32.xlu0 %v4948_v61, %s5285_s16  ;;  %5059 = vrot.lane.b32.xlu1 %v4943_v48, %s5287_s27 }
 0x2b0   : > { %5064 = vrot.lane.b32.xlu0 %v4948_v61, %s5286_s17  ;;  %5074 = vrot.lane.b32.xlu1 %v4948_v61, %s5287_s27 }
 0x2b4   : > { %5069 = vrot.lane.b32.xlu0 %v4943_v48, %s5288_s15  ;;  %5084 = vrot.lane.b32.xlu1 %v4943_v48, %s5289_s30 }
 0x2b8   : > { %5079 = vrot.lane.b32.xlu0 %v4948_v61, %s5288_s15  ;;  %2999 = vperm.xlu1 %5093, %v5706_v8  }
 0x2bc   : > { %5089 = vrot.lane.b32.xlu0 %v4948_v61, %s5289_s30  ;;  %3007 = vperm.xlu1 %5093, %v5726_v13  }
 0x2c0   : > { %3003 = vperm.xlu0 %5094, %v5714_v11   ;;  %3011 = vperm.xlu1 %5093, %v5719_v12   ;;  %v1349_v12 = vld [vmem:[#allocation6 + $0x50] sm:$0xff] }
 0x2c4   : > { %5125 = vset.pattern.permute.xlu0 %v5272_v10  ;;  %5126 = vset.pattern.permute.xlu1 %v5272_v10  ;;  %v1350_v10 = vld [vmem:[#allocation6 + $0x58] sm:$0xff] }
 0x2ee   : > { %v4945_v51 = vpop.permute.xlu1 %4944 }
 0x2ef   : > { %v4947_v44 = vunpack.i.h.bf16 %v4945_v51  ;;  %v4946_v33 = vunpack.i.l.bf16 %v4945_v51  ;;  %v1703_v51 = vld [vmem:[#allocation6 + $0xb0] sm:$0xff] }
 0x2f1   : > { %v4495_v37 = vpack.c.bf16 %v4947_v44, %v4946_v33 }
 0x2f2   : > { %v4955_v52 = vpop.permute.xlu1 %4954 }
 0x2f3   : > { %4496 = vmatprep.subr.bf16.mxu0 %v4495_v37  ;;  %v4957_v16 = vunpack.i.h.bf16 %v4955_v52  ;;  %v4956_v55 = vunpack.i.l.bf16 %v4955_v52 }
 0x2f4   : > { %4498 = vmatpush3.bf16.msra.mxu0 %v4495_v37  ;;  %v1704_v37 = vld [vmem:[#allocation6 + $0xb8] sm:$0xff] }
 0x2f5   : > { %v4503_v47 = vpack.c.bf16 %v4957_v16, %v4956_v55 }
 0x2f6   : > { %v4950_v22 = vpop.permute.xlu0 %4949  ;;  %v4965_v46 = vpop.permute.xlu1 %4964 }
 0x2f7   : > { %v4952_v8 = vunpack.i.h.bf16 %v4950_v22  ;;  %v4951_v38 = vunpack.i.l.bf16 %v4950_v22  ;;  %v4967_v59 = vunpack.i.h.bf16 %v4965_v46  ;;  %v4966_v54 = vunpack.i.l.bf16 %v4965_v46  ;;  %v1819_v22 = vld [vmem:[#allocation6 + $0xc0] sm:$0xff] }
 0x2f9   : > { %v4499_v11 = vpack.c.bf16 %v4952_v8, %v4951_v38  ;;  %v4511_v5 = vpack.c.bf16 %v4967_v59, %v4966_v54  ;;  %v1820_v8 = vld [vmem:[#allocation6 + $0xc8] sm:$0xff] }
 0x2fa   : > { %v4960_v62 = vpop.permute.xlu0 %4959  ;;  %v4975_v56 = vpop.permute.xlu1 %4974 }
 0x2fb   : > { %4500 = vmatprep.subr.bf16.mxu0 %v4499_v11  ;;  %v4962_v13 = vunpack.i.h.bf16 %v4960_v62  ;;  %v4961_v57 = vunpack.i.l.bf16 %v4960_v62  ;;  %v4977_v18 = vunpack.i.h.bf16 %v4975_v56  ;;  %v4976_v20 = vunpack.i.l.bf16 %v4975_v56  ;;  %v1821_v62 = vld [vmem:[#allocation6 + $0xd0] sm:$0xff] }
 0x2fc   : > { %4502 = vmatpush3.bf16.msra.mxu0 %v4499_v11 }
 0x2fd   : > { %v4507_v58 = vpack.c.bf16 %v4962_v13, %v4961_v57  ;;  %4504 = vmatprep.subr.bf16.mxu0 %v4503_v47  ;;  %v4519_v25 = vpack.c.bf16 %v4977_v18, %v4976_v20 }
 0x2fe   : > { %v4970_v60 = vpop.permute.xlu0 %4969  ;;  %v4985_v53 = vpop.permute.xlu1 %4984 }
 0x2ff   : > { %4120 = vmatmul.mubr.msk.f32.vlgmr.msra.gmra.mrb[8].mxu0 %vm1151_vm3, %v1348_v63  ;;  %v4972_v27 = vunpack.i.h.bf16 %v4970_v60  ;;  %v4971_v39 = vunpack.i.l.bf16 %v4970_v60  ;;  %v4987_v19 = vunpack.i.h.bf16 %v4985_v53  ;;  %v4986_v28 = vunpack.i.l.bf16 %v4985_v53  ;;  %v1937_v60 = vld [vmem:[#allocation6 + $0xe0] sm:$0xff] }
 0x300   : > { %4506 = vmatpush3.bf16.msra.mxu0 %v4503_v47  ;;  %4122 = vmatprep.mubr.msk.f32.mxu0 %vm1151_vm3, %v1349_v12 }
 0x301   : > { %4508 = vmatprep.subr.bf16.mxu0 %v4507_v58  ;;  %v4515_v17 = vpack.c.bf16 %v4972_v27, %v4971_v39  ;;  %v4527_v31 = vpack.c.bf16 %v4987_v19, %v4986_v28  ;;  %v1938_v39 = vld [vmem:[#allocation6 + $0xe8] sm:$0xff]  ;;  %v2057_v19 = vld [vmem:[#allocation6 + $0x110] sm:$0xff] }
 0x302   : > { %v4995_v0 = vpop.permute.xlu1 %4994  ;;  %v4980_v1 = vpop.permute.xlu0 %4979 }
 0x303   : > { %4123 = vmatmul.mubr.msk.f32.gmra.mrb[10].mxu0 %vm1151_vm3, %v1350_v10  ;;  %v4982_v26 = vunpack.i.h.bf16 %v4980_v1  ;;  %v4981_v6 = vunpack.i.l.bf16 %v4980_v1  ;;  %v4997_v4 = vunpack.i.h.bf16 %v4995_v0  ;;  %v4996_v7 = vunpack.i.l.bf16 %v4995_v0  ;;  %v1940_v1 = vld [vmem:[#allocation6 + $0xf8] sm:$0xff] }
 0x304   : > { %4510 = vmatpush3.bf16.msra.mxu0 %v4507_v58  ;;  %4133 = vmatprep.mubr.msk.f32.mxu0 %vm1151_vm3, %v1465_v14  ;;  %v1822_v58 = vld [vmem:[#allocation6 + $0xd8] sm:$0xff] }
 0x305   : > { %4512 = vmatprep.subr.bf16.mxu0 %v4511_v5  ;;  %v4523_v35 = vpack.c.bf16 %v4982_v26, %v4981_v6  ;;  %v4535_v52 = vpack.c.bf16 %v4997_v4, %v4996_v7  ;;  %v2055_v26 = vld [vmem:[#allocation6 + $0x100] sm:$0xff]  ;;  %v1132_v6 = vld [vmem:[#allocation6 + $0x28] sm:$0xff]  ;;  %v2175_v7 = vld [vmem:[#allocation6 + $0x130] sm:$0xff] }
 0x306   : > { %v5859_v23 = vpop.permute.xlu1 %5004  ;;  %v4990_v3 = vpop.permute.xlu0 %4989 }
 0x307   : > { %4134 = vmatmul.mubr.msk.f32.vlgmr.msra.gmra.mrb[8].mxu0 %vm1151_vm3, %v1466_v15  ;;  %v4992_v42 = vunpack.i.h.bf16 %v4990_v3  ;;  %v4991_v43 = vunpack.i.l.bf16 %v4990_v3  ;;  %v5007_v11 = vunpack.i.h.bf16 %v5859_v23  ;;  %v5006_v47 = vunpack.i.l.bf16 %v5859_v23 }
 0x308   : > { %4514 = vmatpush3.bf16.msra.mxu0 %v4511_v5  ;;  %4136 = vmatprep.mubr.msk.f32.mxu0 %vm1151_vm3, %v1467_v21  ;;  %v4487_v21 = vpack.c.bf16 %v5820_v36, %v5818_v32  ;;  %v4491_v32 = vpack.c.bf16 %v5830_v45, %v5827_v50  ;;  %v2056_v36 = vld [vmem:[#allocation6 + $0x108] sm:$0xff]  ;;  %v1122_v50 = vld [vmem:[#allocation6] sm:$0xff]  ;;  %v2058_v45 = vld [vmem:[#allocation6 + $0x118] sm:$0xff] }
 0x309   : > { %4516 = vmatprep.subr.bf16.mxu0 %v4515_v17  ;;  %v4531_v61 = vpack.c.bf16 %v4992_v42, %v4991_v43  ;;  %v4543_v59 = vpack.c.bf16 %v5007_v11, %v5006_v47  ;;  %v1123_v42 = vld [vmem:[#allocation6 + $0x8] sm:$0xff]  ;;  %v1124_v43 = vld [vmem:[#allocation6 + $0x10] sm:$0xff] }
 0x30a   : > { %v5863_v30 = vpop.permute.xlu1 %5014  ;;  %v5000_v44 = vpop.permute.xlu0 %4999  ;;  %v2293_v47 = vld [vmem:[#allocation6 + $0x150] sm:$0xff] }
 0x30b   : > { %4137 = vmatmul.mubr.msk.f32.gmra.mrb[10].mxu0 %vm1151_vm3, %v1468_v24  ;;  %v5002_v16 = vunpack.i.h.bf16 %v5000_v44  ;;  %v5001_v55 = vunpack.i.l.bf16 %v5000_v44  ;;  %v5017_v0 = vunpack.i.h.bf16 %v5863_v30  ;;  %v5016_v15 = vunpack.i.l.bf16 %v5863_v30  ;;  %v1125_v44 = vld [vmem:[#allocation6 + $0x18] sm:$0xff] }
 0x30c   : > { %4518 = vmatpush3.bf16.msra.mxu0 %v4515_v17  ;;  %4147 = vmatprep.mubr.msk.f32.mxu0 %vm1151_vm3, %v1583_v29  ;;  %v1939_v17 = vld [vmem:[#allocation6 + $0xf0] sm:$0xff] }
 0x30d   : > { %4520 = vmatprep.subr.bf16.mxu0 %v4519_v25  ;;  %v4539_v38 = vpack.c.bf16 %v5002_v16, %v5001_v55  ;;  %v4551_v23 = vpack.c.bf16 %v5017_v0, %v5016_v15  ;;  %v1133_v29 = vld [vmem:[#allocation6 + $0x30] sm:$0xff]  ;;  %v2527_v0 = vld [vmem:[#allocation6 + $0x180] sm:$0xff]  ;;  %v2528_v15 = vld [vmem:[#allocation6 + $0x188] sm:$0xff] }
 0x30e   : > { %v5867_v9 = vpop.permute.xlu1 %5024  ;;  %v5010_v56 = vpop.permute.xlu0 %5009 }
 0x30f   : > { %4148 = vmatmul.mubr.msk.f32.vlgmr.msra.gmra.mrb[8].mxu0 %vm1151_vm3, %v1584_v2  ;;  %v5012_v54 = vunpack.i.h.bf16 %v5010_v56  ;;  %v5011_v12 = vunpack.i.l.bf16 %v5010_v56  ;;  %v5027_v2 = vunpack.i.h.bf16 %v5867_v9  ;;  %v2294_v56 = vld [vmem:[#allocation6 + $0x158] sm:$0xff] }
 0x310   : > { %4522 = vmatpush3.bf16.msra.mxu0 %v4519_v25  ;;  %4150 = vmatprep.mubr.msk.f32.mxu0 %vm1151_vm3, %v1585_v40  ;;  %v1134_v40 = vld [vmem:[#allocation6 + $0x38] sm:$0xff] }
 0x311   : > { %4524 = vmatprep.subr.bf16.mxu0 %v4523_v35  ;;  %v4547_v14 = vpack.c.bf16 %v5012_v54, %v5011_v12 }
 0x312   : > { %v5871_v48 = vpop.permute.xlu1 %5034  ;;  %v5020_v20 = vpop.permute.xlu0 %5019 }
 0x313   : > { %4151 = vmatmul.mubr.msk.f32.gmra.mrb[10].mxu0 %vm1151_vm3, %v1586_v41  ;;  %v5022_v24 = vunpack.i.h.bf16 %v5020_v20  ;;  %v5021_v25 = vunpack.i.l.bf16 %v5020_v20  ;;  %v5036_v4 = vunpack.i.l.bf16 %v5871_v48  ;;  %v2529_v20 = vld [vmem:[#allocation6 + $0x190] sm:$0xff] }
 0x314   : > { %4526 = vmatpush3.bf16.msra.mxu0 %v4523_v35  ;;  %4161 = vmatprep.mubr.msk.f32.mxu0 %vm1151_vm3, %v1701_v34  ;;  %v5026_v35 = vunpack.i.l.bf16 %v5867_v9  ;;  %v2174_v34 = vld [vmem:[#allocation6 + $0x128] sm:$0xff] }
 0x315   : > { %4528 = vmatprep.subr.bf16.mxu0 %v4527_v31  ;;  %v4555_v30 = vpack.c.bf16 %v5022_v24, %v5021_v25 }
 0x316   : > { %v5875_v33 = vpop.permute.xlu1 %5044  ;;  %v5030_v28 = vpop.permute.xlu0 %5029  ;;  %v4559_v3 = vpack.c.bf16 %v5027_v2, %v5026_v35  ;;  %v2647_v2 = vld [vmem:[#allocation6 + $0x1b0] sm:$0xff] }
 0x317   : > { %4162 = vmatmul.mubr.msk.f32.vlgmr.msra.gmra.mrb[8].mxu0 %vm1151_vm3, %v1702_v49  ;;  %v5032_v41 = vunpack.i.h.bf16 %v5030_v28  ;;  %v5031_v9 = vunpack.i.l.bf16 %v5030_v28  ;;  %v5046_v11 = vunpack.i.l.bf16 %v5875_v33 }
 0x318   : > { %4530 = vmatpush3.bf16.msra.mxu0 %v4527_v31  ;;  %4164 = vmatprep.mubr.msk.f32.mxu0 %vm1151_vm3, %v1703_v51  ;;  %v2173_v31 = vld [vmem:[#allocation6 + $0x120] sm:$0xff] }
 0x319   : > { %4532 = vmatprep.subr.bf16.mxu0 %v4531_v61  ;;  %v4563_v49 = vpack.c.bf16 %v5032_v41, %v5031_v9  ;;  %v2765_v9 = vld [vmem:[#allocation6 + $0x1d0] sm:$0xff] }
 0x31a   : > { %v5879_v46 = vpop.permute.xlu1 %5054  ;;  %v5040_v51 = vpop.permute.xlu0 %5039 }
 0x31b   : > { %4165 = vmatmul.mubr.msk.f32.gmra.mrb[10].mxu0 %vm1151_vm3, %v1704_v37  ;;  %v2176_v37 = vld [vmem:[#allocation6 + $0x138] sm:$0xff]  ;;  %v5042_v16 = vunpack.i.h.bf16 %v5040_v51  ;;  %v5041_v55 = vunpack.i.l.bf16 %v5040_v51  ;;  %v5057_v12 = vunpack.i.h.bf16 %v5879_v46 }
 0x31c   : > { %4534 = vmatpush3.bf16.msra.mxu0 %v4531_v61  ;;  %4175 = vmatprep.mubr.msk.f32.mxu0 %vm1151_vm3, %v1819_v22  ;;  %v5037_v61 = vunpack.i.h.bf16 %v5871_v48  ;;  %v2291_v22 = vld [vmem:[#allocation6 + $0x140] sm:$0xff]  ;;  %v2292_v48 = vld [vmem:[#allocation6 + $0x148] sm:$0xff] }
 0x31d   : > { %4536 = vmatprep.subr.bf16.mxu0 %v4535_v52 }
 0x31e   : > { %v5060_v13 = vpop.permute.xlu1 %5059 }
 0x31f   : > { %4176 = vmatmul.mubr.msk.f32.vlgmr.msra.gmra.mrb[8].mxu0 %vm1151_vm3, %v1820_v8  ;;  %v5062_v57 = vunpack.i.h.bf16 %v5060_v13  ;;  %v5061_v63 = vunpack.i.l.bf16 %v5060_v13  ;;  %v4571_v8 = vpack.c.bf16 %v5042_v16, %v5041_v55 }
 0x320   : > { %4538 = vmatpush3.bf16.msra.mxu0 %v4535_v52  ;;  %4178 = vmatprep.mubr.msk.f32.mxu0 %vm1151_vm3, %v1821_v62  ;;  %v4567_v52 = vpack.c.bf16 %v5037_v61, %v5036_v4  ;;  %v5050_v62 = vpop.permute.xlu0 %5049 }
 0x321   : > { %4540 = vmatprep.subr.bf16.mxu0 %v4539_v38  ;;  %v4479_v53 = vpack.c.bf16 %v5062_v57, %v5061_v63  ;;  %v5052_v57 = vunpack.i.h.bf16 %v5050_v62  ;;  %v5051_v63 = vunpack.i.l.bf16 %v5050_v62 }
 0x322   : > { %v5075_v10 = vpop.permute.xlu1 %5074 }
 0x323   : > { %4179 = vmatmul.mubr.msk.f32.gmra.mrb[10].mxu0 %vm1151_vm3, %v1822_v58  ;;  %v5077_v5 = vunpack.i.h.bf16 %v5075_v10  ;;  %v5076_v27 = vunpack.i.l.bf16 %v5075_v10  ;;  %4480 = vmatprep.subr.bf16.mxu1 %v4479_v53  ;;  %v2409_v58 = vld [vmem:[#allocation6 + $0x160] sm:$0xff]  ;;  %v4579_v54 = vpack.c.bf16 %v5052_v57, %v5051_v63  ;;  %v2412_v10 = vld [vmem:[#allocation6 + $0x178] sm:$0xff] }
 0x324   : > { %4542 = vmatpush3.bf16.msra.mxu0 %v4539_v38  ;;  %4189 = vmatprep.mubr.msk.f32.mxu0 %vm1151_vm3, %v1937_v60  ;;  %v5047_v38 = vunpack.i.h.bf16 %v5875_v33  ;;  %v2410_v33 = vld [vmem:[#allocation6 + $0x168] sm:$0xff]  ;;  %v5056_v60 = vunpack.i.l.bf16 %v5879_v46 }
 0x325   : > { %4544 = vmatprep.subr.bf16.mxu0 %v4543_v59  ;;  %v4483_v18 = vpack.c.bf16 %v5077_v5, %v5076_v27  ;;  %4482 = vmatpush3.bf16.msra.mxu1 %v4479_v53  ;;  %v2411_v53 = vld [vmem:[#allocation6 + $0x170] sm:$0xff] }
 0x326   : > { %v4575_v13 = vpack.c.bf16 %v5047_v38, %v5046_v11  ;;  %v4583_v27 = vpack.c.bf16 %v5057_v12, %v5056_v60 }
 0x327   : > { %4190 = vmatmul.mubr.msk.f32.vlgmr.msra.gmra.mrb[8].mxu0 %vm1151_vm3, %v1938_v39  ;;  %4484 = vmatprep.subr.bf16.mxu1 %v4483_v18 }
 0x328   : > { %4546 = vmatpush3.bf16.msra.mxu0 %v4543_v59  ;;  %4192 = vmatprep.mubr.msk.f32.mxu0 %vm1151_vm3, %v1939_v17  ;;  %v5065_v59 = vpop.permute.xlu0 %5064 }
 0x329   : > { %4548 = vmatprep.subr.bf16.mxu0 %v4547_v14  ;;  %4486 = vmatpush3.bf16.msra.mxu1 %v4483_v18  ;;  %v5067_v39 = vunpack.i.h.bf16 %v5065_v59 }
 0x32a   : > { %4488 = vmatprep.subr.bf16.mxu1 %v4487_v21 }
 0x32b   : > { %4193 = vmatmul.mubr.msk.f32.gmra.mrb[10].mxu0 %vm1151_vm3, %v1940_v1  ;;  %v2530_v1 = vld [vmem:[#allocation6 + $0x198] sm:$0xff] }
 0x32c   : > { %4550 = vmatpush3.bf16.msra.mxu0 %v4547_v14  ;;  %4203 = vmatprep.mubr.msk.f32.mxu0 %vm1151_vm3, %v2055_v26  ;;  %v5070_v5 = vpop.permute.xlu0 %5069  ;;  %v5066_v14 = vunpack.i.l.bf16 %v5065_v59  ;;  %v2645_v26 = vld [vmem:[#allocation6 + $0x1a0] sm:$0xff] }
 0x32d   : > { %4552 = vmatprep.subr.bf16.mxu0 %v4551_v23  ;;  %4092 = vmatmul.mubr.msk.f32.vlgmr.msra.gmra.mrb[24].mxu1 %vm1151_vm3, %v1132_v6  ;;  %v5072_v17 = vunpack.i.h.bf16 %v5070_v5  ;;  %v5071_v18 = vunpack.i.l.bf16 %v5070_v5  ;;  %v5085_v6 = vpop.permute.xlu1 %5084 }
 0x32e   : > { %4490 = vmatpush3.bf16.msra.mxu1 %v4487_v21  ;;  %4094 = vmatprep.mubr.msk.f32.mxu1 %vm1151_vm3, %v1133_v29  ;;  %v4587_v46 = vpack.c.bf16 %v5067_v39, %v5066_v14  ;;  %v2646_v29 = vld [vmem:[#allocation6 + $0x1a8] sm:$0xff] }
 0x32f   : > { %4204 = vmatmul.mubr.msk.f32.vlgmr.msra.gmra.mrb[8].mxu0 %vm1151_vm3, %v2056_v36  ;;  %4492 = vmatprep.subr.bf16.mxu1 %v4491_v32  ;;  %v5087_v36 = vunpack.i.h.bf16 %v5085_v6 }
 0x330   : > { %4554 = vmatpush3.bf16.msra.mxu0 %v4551_v23  ;;  %4206 = vmatprep.mubr.msk.f32.mxu0 %vm1151_vm3, %v2057_v19  ;;  %v5080_v21 = vpop.permute.xlu0 %5079  ;;  %v4591_v23 = vpack.c.bf16 %v5072_v17, %v5071_v18  ;;  %v2648_v19 = vld [vmem:[#allocation6 + $0x1b8] sm:$0xff] }
 0x331   : > { %4556 = vmatprep.subr.bf16.mxu0 %v4555_v30  ;;  %4095 = vmatmul.mubr.msk.f32.gmra.mrb[26].mxu1 %vm1151_vm3, %v1134_v40  ;;  %v5082_v24 = vunpack.i.h.bf16 %v5080_v21  ;;  %v5081_v25 = vunpack.i.l.bf16 %v5080_v21 }
 0x332   : > { %4494 = vmatpush3.bf16.msra.mxu1 %v4491_v32  ;;  %4105 = vmatprep.mubr.msk.f32.mxu1 %vm1151_vm3, %v1122_v50 }
 0x333   : > { %4207 = vmatmul.mubr.msk.f32.gmra.mrb[10].mxu0 %vm1151_vm3, %v2058_v45  ;;  %v4595_v32 = vpack.c.bf16 %v5082_v24, %v5081_v25  ;;  %v2763_v45 = vld [vmem:[#allocation6 + $0x1c0] sm:$0xff] }
 0x334   : > { %4558 = vmatpush3.bf16.msra.mxu0 %v4555_v30  ;;  %4217 = vmatprep.mubr.msk.f32.mxu0 %vm1151_vm3, %v2173_v31  ;;  %v5086_v30 = vunpack.i.l.bf16 %v5085_v6  ;;  %v5090_v35 = vpop.permute.xlu0 %5089  ;;  %v2766_v31 = vld [vmem:[#allocation6 + $0x1d8] sm:$0xff] }
 0x335   : > { %4560 = vmatprep.subr.bf16.mxu0 %v4559_v3  ;;  %4106 = vmatmul.mubr.msk.f32.vlgmr.msra.gmra.mrb[24].mxu1 %vm1151_vm3, %v1123_v42  ;;  %v5092_v40 = vunpack.i.h.bf16 %v5090_v35  ;;  %v5091_v50 = vunpack.i.l.bf16 %v5090_v35  ;;  %v2881_v42 = vld [vmem:[#allocation6 + $0x1e0] sm:$0xff] }
 0x336   : > { %4108 = vmatprep.mubr.msk.f32.mxu1 %vm1151_vm3, %v1124_v43  ;;  %v4599_v28 = vpack.c.bf16 %v5087_v36, %v5086_v30  ;;  %v2882_v43 = vld [vmem:[#allocation6 + $0x1e8] sm:$0xff] }
 0x337   : > { %4218 = vmatmul.mubr.msk.f32.vlgmr.msra.gmra.mrb[8].mxu0 %vm1151_vm3, %v2174_v34  ;;  %v4603_v41 = vpack.c.bf16 %v5092_v40, %v5091_v50  ;;  %v2883_v34 = vld [vmem:[#allocation6 + $0x1f0] sm:$0xff] }
 0x338   : > { %4562 = vmatpush3.bf16.msra.mxu0 %v4559_v3  ;;  %4220 = vmatprep.mubr.msk.f32.mxu0 %vm1151_vm3, %v2175_v7  ;;  %v2764_v3 = vld [vmem:[#allocation6 + $0x1c8] sm:$0xff] }
 0x339   : > { %4564 = vmatprep.subr.bf16.mxu0 %v4563_v49  ;;  %4109 = vmatmul.mubr.msk.f32.gmra.mrb[26].mxu1 %vm1151_vm3, %v1125_v44  ;;  %v3000_v44 = vpop.permute.xlu1 %2999 }
 0x33b   : > { %4221 = vmatmul.mubr.msk.f32.gmra.mrb[10].mxu0 %vm1151_vm3, %v2176_v37 }
 0x33c   : > { %4566 = vmatpush3.bf16.msra.mxu0 %v4563_v49  ;;  %4231 = vmatprep.mubr.msk.f32.mxu0 %vm1151_vm3, %v2291_v22  ;;  %v2884_v49 = vld [vmem:[#allocation6 + $0x1f8] sm:$0xff] }
 0x33d   : > { %4568 = vmatprep.subr.bf16.mxu0 %v4567_v52  ;;  %v3008_v37 = vpop.permute.xlu1 %3007 }
 0x33f   : > { %4232 = vmatmul.mubr.msk.f32.vlgmr.msra.gmra.mrb[8].mxu0 %vm1151_vm3, %v2292_v48  ;;  %v3004_v16 = vpop.permute.xlu0 %3003 }
 0x340   : > { %4570 = vmatpush3.bf16.msra.mxu0 %v4567_v52  ;;  %4234 = vmatprep.mubr.msk.f32.mxu0 %vm1151_vm3, %v2293_v47 }
 0x341   : > { %4572 = vmatprep.subr.bf16.mxu0 %v4571_v8  ;;  %v3012_v63 = vpop.permute.xlu1 %3011 }
 0x343   : > { %4235 = vmatmul.mubr.msk.f32.gmra.mrb[10].mxu0 %vm1151_vm3, %v2294_v56 }
 0x344   : > { %4574 = vmatpush3.bf16.msra.mxu0 %v4571_v8  ;;  %4245 = vmatprep.mubr.msk.f32.mxu0 %vm1151_vm3, %v2409_v58 }
 0x345   : > { %4576 = vmatprep.subr.bf16.mxu0 %v4575_v13 }
 0x347   : > { %4246 = vmatmul.mubr.msk.f32.vlgmr.msra.gmra.mrb[8].mxu0 %vm1151_vm3, %v2410_v33 }
 0x348   : > { %4578 = vmatpush3.bf16.msra.mxu0 %v4575_v13  ;;  %4248 = vmatprep.mubr.msk.f32.mxu0 %vm1151_vm3, %v2411_v53 }
 0x349   : > { %4580 = vmatprep.subr.bf16.mxu0 %v4579_v54 }
 0x34b   : > { %4249 = vmatmul.mubr.msk.f32.gmra.mrb[10].mxu0 %vm1151_vm3, %v2412_v10 }
 0x34c   : > { %4582 = vmatpush3.bf16.msra.mxu0 %v4579_v54  ;;  %4259 = vmatprep.mubr.msk.f32.mxu0 %vm1151_vm3, %v2527_v0 }
 0x34d   : > { %4584 = vmatprep.subr.bf16.mxu0 %v4583_v27 }
 0x34f   : > { %4260 = vmatmul.mubr.msk.f32.vlgmr.msra.gmra.mrb[8].mxu0 %vm1151_vm3, %v2528_v15 }
 0x350   : > { %4586 = vmatpush3.bf16.msra.mxu0 %v4583_v27  ;;  %4262 = vmatprep.mubr.msk.f32.mxu0 %vm1151_vm3, %v2529_v20 }
 0x351   : > { %4588 = vmatprep.subr.bf16.mxu0 %v4587_v46 }
 0x353   : > { %4263 = vmatmul.mubr.msk.f32.gmra.mrb[10].mxu0 %vm1151_vm3, %v2530_v1 }
 0x354   : > { %4590 = vmatpush3.bf16.msra.mxu0 %v4587_v46  ;;  %4273 = vmatprep.mubr.msk.f32.mxu0 %vm1151_vm3, %v2645_v26 }
 0x355   : > { %4592 = vmatprep.subr.bf16.mxu0 %v4591_v23 }
 0x357   : > { %4274 = vmatmul.mubr.msk.f32.vlgmr.msra.gmra.mrb[8].mxu0 %vm1151_vm3, %v2646_v29 }
 0x358   : > { %4594 = vmatpush3.bf16.msra.mxu0 %v4591_v23  ;;  %4276 = vmatprep.mubr.msk.f32.mxu0 %vm1151_vm3, %v2647_v2 }
 0x359   : > { %4596 = vmatprep.subr.bf16.mxu0 %v4595_v32 }
 0x35b   : > { %4277 = vmatmul.mubr.msk.f32.gmra.mrb[10].mxu0 %vm1151_vm3, %v2648_v19 }
 0x35c   : > { %4598 = vmatpush3.bf16.msra.mxu0 %v4595_v32  ;;  %4287 = vmatprep.mubr.msk.f32.mxu0 %vm1151_vm3, %v2763_v45 }
 0x35d   : > { %4600 = vmatprep.subr.bf16.mxu0 %v4599_v28 }
 0x35f   : > { %4288 = vmatmul.mubr.msk.f32.vlgmr.msra.gmra.mrb[8].mxu0 %vm1151_vm3, %v2764_v3 }
 0x360   : > { %4602 = vmatpush3.bf16.msra.mxu0 %v4599_v28  ;;  %4290 = vmatprep.mubr.msk.f32.mxu0 %vm1151_vm3, %v2765_v9 }
 0x361   : > { %4604 = vmatprep.subr.bf16.mxu0 %v4603_v41 }
 0x363   : > { %4291 = vmatmul.mubr.msk.f32.gmra.mrb[10].mxu0 %vm1151_vm3, %v2766_v31 }
 0x364   : > { %4606 = vmatpush3.bf16.msra.mxu0 %v4603_v41  ;;  %4301 = vmatprep.mubr.msk.f32.mxu0 %vm1151_vm3, %v2881_v42 }
 0x367   : > { %4302 = vmatmul.mubr.msk.f32.vlgmr.msra.gmra.mrb[8].mxu0 %vm1151_vm3, %v2882_v43 }
 0x368   : > { %4304 = vmatprep.mubr.msk.f32.mxu0 %vm1151_vm3, %v2883_v34 }
 0x36b   : > { %4305 = vmatmul.mubr.msk.f32.gmra.mrb[10].mxu0 %vm1151_vm3, %v2884_v49 }
 0x408   : > { %v4107_v61 = vpop.f32.mrb[24].mxu1 }
 0x409   : > { %v1327_v4 = vpop.f32.mrb[25].mxu1 }
 0x40c   : > { %v4110_v7 = vpop.f32.mrb[26].mxu1 }
 0x40d   : > { %v1337_v51 = vpop.f32.mrb[27].mxu1 }
 0x43a   : > { %v4303_v52 = vpop.f32.mrb[8].mxu0 }
 0x43b   : > { %v4639_v55 = vadd.f32 %v4303_v52, %v4107_v61  ;;  %v2975_v22 = vpop.f32.mrb[9].mxu0 }
 0x43c   : > { %v4640_v48 = vadd.f32 %v2975_v22, %v1327_v4 }
 0x43d   : > { %v3015_v8 = vadd.f32 %v4639_v55, %v3004_v16 }
 0x43e   : > { %v3014_v38 = vadd.f32 %v4640_v48, %v3000_v44  ;;  %v4306_v11 = vpop.f32.mrb[10].mxu0 }
 0x43f   : > { %v3023_v47 = vmin.f32 %v3015_v8, 0.0  ;;  %v4641_v62 = vadd.f32 %v4306_v11, %v4110_v7  ;;  %v2985_v56 = vpop.f32.mrb[11].mxu0  ;;  %vm3019_vm5 = vcmp.gt.f32.partialorder %v3015_v8, 0.0 }
 0x440   : > { %v3022_v13 = vmin.f32 %v3014_v38, 0.0  ;;  %v4642_v57 = vadd.f32 %v2985_v56, %v1337_v51  ;;  %vm3018_vm6 = vcmp.gt.f32.partialorder %v3014_v38, 0.0 }
 0x441   : > { %v3028_v58 = vmul.f32 1.442695, %v3023_v47  ;;  %v3017_v59 = vadd.f32 %v4641_v62, %v3012_v63 }
 0x442   : > { %v3026_v33 = vmul.f32 1.442695, %v3022_v13  ;;  %v3016_v54 = vadd.f32 %v4642_v57, %v3008_v37 }
 0x443   : > { %5159 = vpow2.f32 %v3028_v58  ;;  %v3025_v12 = vmin.f32 %v3017_v59, 0.0  ;;  %vm3021_vm7 = vcmp.gt.f32.partialorder %v3017_v59, 0.0 }
 0x444   : > { %5161 = vpow2.f32 %v3026_v33  ;;  %v3024_v60 = vmin.f32 %v3016_v54, 0.0  ;;  %vm3020_vm8 = vcmp.gt.f32.partialorder %v3016_v54, 0.0 }
 0x445   : > { %v3032_v53 = vmul.f32 1.442695, %v3025_v12 }
 0x446   : > { %v3030_v10 = vmul.f32 1.442695, %v3024_v60 }
 0x447   : > { %5163 = vpow2.f32 %v3032_v53 }
 0x448   : > { %5165 = vpow2.f32 %v3030_v10 }
 0x44d   : > { %v5160_v5 = vpop.eup %5159 }
 0x44e   : > { %v5162_v27 = vpop.eup %5161  ;;  %v3734_v39 = vadd.f32 -1.0, %v5160_v5 }
 0x44f   : > { %v3733_v14 = vadd.f32 -1.0, %v5162_v27 }
 0x450   : > { %v3039_v0 = vsel %vm3019_vm5, %v3015_v8, %v3734_v39 }
 0x451   : > { %v5164_v15 = vpop.eup %5163  ;;  %v3038_v46 = vsel %vm3018_vm6, %v3014_v38, %v3733_v14  ;;  %3044 = vst.msk [vmem:[#allocation3 + $0x8] sm:$0xff] %vm3042_vm4, %v3039_v0 }
 0x452   : > { %v5166_v17 = vpop.eup %5165  ;;  %3043 = vst.msk [vmem:[#allocation3] sm:$0xff] %vm3042_vm4, %v3038_v46  ;;  %v3736_v18 = vadd.f32 -1.0, %v5164_v15  ;;  %v3737_v15 = vld [vmem:[%s6047_s4 + $0x10] sm:$0xff] }
 0x453   : > { %v3735_v20 = vadd.f32 -1.0, %v5166_v17  ;;  %4315 = vmatprep.mubr.msk.f32.mxu1 %vm1151_vm3, %v3737_v15 }
 0x454   : > { %v3041_v21 = vsel %vm3021_vm7, %v3017_v59, %v3736_v18 }
 0x455   : > { %v3040_v1 = vsel %vm3020_vm8, %v3016_v54, %v3735_v20  ;;  %3046 = vst.msk [vmem:[#allocation3 + $0x18] sm:$0xff] %vm3042_vm4, %v3041_v21 }
 0x456   : > { %3045 = vst.msk [vmem:[#allocation3 + $0x10] sm:$0xff] %vm3042_vm4, %v3040_v1 }
 0x458   : > { %v3048_v23 = vld [vmem:[#allocation3 + $0x8] sm:$0xff] }
 0x459   : > { %3057 = vrot.lane.b32.xlu1 %v3048_v23, %s5287_s27  ;;  %v3047_v24 = vld [vmem:[#allocation3] sm:$0xff] }
 0x45a   : > { %3055 = vrot.lane.b32.xlu0 %v3047_v24, %s5287_s27 }
 0x45c   : > { %v3050_v25 = vld [vmem:[#allocation3 + $0x18] sm:$0xff] }
 0x45d   : > { %3073 = vrot.lane.b32.xlu1 %v3048_v23, %s5275_s19  ;;  %v3049_v26 = vld [vmem:[#allocation3 + $0x10] sm:$0xff] }
 0x45e   : > { %3071 = vrot.lane.b32.xlu0 %v3047_v24, %s5275_s19 }
 0x461   : > { %3089 = vrot.lane.b32.xlu1 %v3048_v23, %s5276_s20 }
 0x462   : > { %3087 = vrot.lane.b32.xlu0 %v3047_v24, %s5276_s20 }
 0x465   : > { %3105 = vrot.lane.b32.xlu1 %v3048_v23, %s5277_s21 }
 0x466   : > { %3103 = vrot.lane.b32.xlu0 %v3047_v24, %s5277_s21 }
 0x469   : > { %3121 = vrot.lane.b32.xlu1 %v3048_v23, %s5278_s10 }
 0x46a   : > { %3119 = vrot.lane.b32.xlu0 %v3047_v24, %s5278_s10 }
 0x46d   : > { %3137 = vrot.lane.b32.xlu1 %v3048_v23, %s5279_s11 }
 0x46e   : > { %3135 = vrot.lane.b32.xlu0 %v3047_v24, %s5279_s11 }
 0x471   : > { %3153 = vrot.lane.b32.xlu1 %v3048_v23, %s5280_s12 }
 0x472   : > { %3151 = vrot.lane.b32.xlu0 %v3047_v24, %s5280_s12 }
 0x475   : > { %3061 = vrot.lane.b32.xlu1 %v3050_v25, %s5287_s27 }
 0x476   : > { %3059 = vrot.lane.b32.xlu0 %v3049_v26, %s5287_s27 }
 0x479   : > { %3077 = vrot.lane.b32.xlu1 %v3050_v25, %s5275_s19 }
 0x47a   : > { %3075 = vrot.lane.b32.xlu0 %v3049_v26, %s5275_s19 }
 0x47d   : > { %3093 = vrot.lane.b32.xlu1 %v3050_v25, %s5276_s20 }
 0x47e   : > { %3091 = vrot.lane.b32.xlu0 %v3049_v26, %s5276_s20 }
 0x481   : > { %3109 = vrot.lane.b32.xlu1 %v3050_v25, %s5277_s21 }
 0x482   : > { %3107 = vrot.lane.b32.xlu0 %v3049_v26, %s5277_s21  ;;  %s286_s21 = scalar_lea.vmem %s6049_s6, %s3754_s18 }
 0x485   : > { %3125 = vrot.lane.b32.xlu1 %v3050_v25, %s5278_s10 }
 0x486   : > { %3123 = vrot.lane.b32.xlu0 %v3049_v26, %s5278_s10 }
 0x489   : > { %3141 = vrot.lane.b32.xlu1 %v3050_v25, %s5279_s11 }
 0x48a   : > { %3139 = vrot.lane.b32.xlu0 %v3049_v26, %s5279_s11 }
 0x48d   : > { %3157 = vrot.lane.b32.xlu1 %v3050_v25, %s5280_s12 }
 0x48e   : > { %3155 = vrot.lane.b32.xlu0 %v3049_v26, %s5280_s12 }
 0x4cb   : > { %v3058_v6 = vpop.permute.xlu1 %3057 }
 0x4cc   : > { %v3056_v29 = vpop.permute.xlu0 %3055  ;;  %v3068_v19 = vadd.f32 %v3058_v6, %v3048_v23 }
 0x4cd   : > { %v3067_v40 = vadd.f32 %v3056_v29, %v3047_v24  ;;  %v3547_v24 = vld [vmem:[%s6048_s5 + $0x8] sm:$0x3] }
 0x4cf   : > { %v3074_v32 = vpop.permute.xlu1 %3073 }
 0x4d0   : > { %v3072_v36 = vpop.permute.xlu0 %3071  ;;  %v3084_v50 = vadd.f32 %v3074_v32, %v3068_v19 }
 0x4d1   : > { %v3083_v45 = vadd.f32 %v3072_v36, %v3067_v40  ;;  %v3167_v40 = vld [vmem:[%s6047_s4] sm:$0xff] }
 0x4d3   : > { %v3090_v30 = vpop.permute.xlu1 %3089 }
 0x4d4   : > { %v3088_v2 = vpop.permute.xlu0 %3087  ;;  %v3100_v41 = vadd.f32 %v3090_v30, %v3084_v50 }
 0x4d5   : > { %v3099_v31 = vadd.f32 %v3088_v2, %v3083_v45 }
 0x4d7   : > { %v3106_v35 = vpop.permute.xlu1 %3105 }
 0x4d8   : > { %v3104_v28 = vpop.permute.xlu0 %3103  ;;  %v3116_v42 = vadd.f32 %v3106_v35, %v3100_v41 }
 0x4d9   : > { %v3115_v43 = vadd.f32 %v3104_v28, %v3099_v31  ;;  %v3738_v28 = vld [vmem:[%s6047_s4 + $0x18] sm:$0x3] }
 0x4db   : > { %v3122_v3 = vpop.permute.xlu1 %3121 }
 0x4dc   : > { %v3120_v9 = vpop.permute.xlu0 %3119  ;;  %v3132_v49 = vadd.f32 %v3122_v3, %v3116_v42 }
 0x4dd   : > { %v3131_v4 = vadd.f32 %v3120_v9, %v3115_v43  ;;  %v3168_v43 = vld [vmem:[%s6047_s4 + $0x8] sm:$0x3] }
 0x4df   : > { %v3138_v34 = vpop.permute.xlu1 %3137 }
 0x4e0   : > { %v3136_v61 = vpop.permute.xlu0 %3135  ;;  %v3148_v7 = vadd.f32 %v3138_v34, %v3132_v49  ;;  %v3743_v34 = vld [vmem:[%s6047_s4 + $0x20] sm:$0xff] }
 0x4e1   : > { %v3147_v51 = vadd.f32 %v3136_v61, %v3131_v4 }
 0x4e3   : > { %v3154_v44 = vpop.permute.xlu1 %3153 }
 0x4e4   : > { %v3164_v37 = vadd.f32 %v3154_v44, %v3148_v7  ;;  %v3152_v52 = vpop.permute.xlu0 %3151 }
 0x4e5   : > { %v3163_v16 = vadd.f32 %v3152_v52, %v3147_v51  ;;  %v3744_v52 = vld [vmem:[%s6047_s4 + $0x28] sm:$0x3] }
 0x4e7   : > { %v3062_v55 = vpop.permute.xlu1 %3061  ;;  %v5095_v22 = vpack.i.bf16 %v3164_v37, %v3163_v16  ;;  %v5977_v48 = vpack.c.bf16 %v3164_v37, %v3163_v16  ;;  %v3747_v16 = vld [vmem:[%s6047_s4 + $0x30] sm:$0xff] }
 0x4e8   : > { %v3060_v8 = vpop.permute.xlu0 %3059  ;;  %v3070_v13 = vadd.f32 %v3062_v55, %v3050_v25  ;;  %v3546_v25 = vld [vmem:[%s6048_s5] sm:$0xff] }
 0x4e9   : > { %5096 = vrot.lane.b32.xlu0 %v5095_v22, %s5281_s13  ;;  %v3069_v63 = vadd.f32 %v3060_v8, %v3049_v26 }
 0x4eb   : > { %v3078_v38 = vpop.permute.xlu1 %3077 }
 0x4ec   : > { %v3076_v11 = vpop.permute.xlu0 %3075  ;;  %v3086_v58 = vadd.f32 %v3078_v38, %v3070_v13 }
 0x4ed   : > { %5106 = vrot.lane.b32.xlu0 %v5095_v22, %s5291_s8  ;;  %v3085_v59 = vadd.f32 %v3076_v11, %v3069_v63 }
 0x4ef   : > { %v3094_v47 = vpop.permute.xlu1 %3093 }
 0x4f0   : > { %v3092_v62 = vpop.permute.xlu0 %3091  ;;  %v3102_v54 = vadd.f32 %v3094_v47, %v3086_v58 }
 0x4f1   : > { %5116 = vrot.lane.b32.xlu0 %v5095_v22, %s5292_s26  ;;  %v3101_v60 = vadd.f32 %v3092_v62, %v3085_v59  ;;  %v3748_v22 = vld [vmem:[%s6047_s4 + $0x38] sm:$0x3] }
 0x4f3   : > { %v3110_v56 = vpop.permute.xlu1 %3109 }
 0x4f4   : > { %v3108_v57 = vpop.permute.xlu0 %3107  ;;  %v3118_v53 = vadd.f32 %v3110_v56, %v3102_v54 }
 0x4f5   : > { %v3117_v10 = vadd.f32 %v3108_v57, %v3101_v60  ;;  %3550 = vperm.xlu0 %5125, %v3546_v25  }
 0x4f7   : > { %v3126_v33 = vpop.permute.xlu1 %3125 }
 0x4f8   : > { %v3124_v12 = vpop.permute.xlu0 %3123  ;;  %v3134_v27 = vadd.f32 %v3126_v33, %v3118_v53 }
 0x4f9   : > { %v3133_v14 = vadd.f32 %v3124_v12, %v3117_v10 }
 0x4fb   : > { %v3142_v5 = vpop.permute.xlu1 %3141 }
 0x4fc   : > { %v3140_v39 = vpop.permute.xlu0 %3139  ;;  %v3150_v0 = vadd.f32 %v3142_v5, %v3134_v27 }
 0x4fd   : > { %v3149_v46 = vadd.f32 %v3140_v39, %v3133_v14 }
 0x4ff   : > { %v3158_v17 = vpop.permute.xlu1 %3157 }
 0x500   : > { %v3166_v18 = vadd.f32 %v3158_v17, %v3150_v0  ;;  %v3156_v20 = vpop.permute.xlu0 %3155 }
 0x501   : > { %v3165_v21 = vadd.f32 %v3156_v20, %v3149_v46 }
 0x503   : > { %v5100_v1 = vpack.i.bf16 %v3166_v18, %v3165_v21  ;;  %v4619_v23 = vpack.c.bf16 %v3166_v18, %v3165_v21 }
 0x505   : > { %5101 = vrot.lane.b32.xlu1 %v5100_v1, %s5281_s13 }
 0x509   : > { %5111 = vrot.lane.b32.xlu1 %v5100_v1, %s5291_s8 }
 0x50d   : > { %5121 = vrot.lane.b32.xlu1 %v5100_v1, %s5292_s26 }
 0x511   : > { %3555 = vperm.xlu1 %5126, %v3547_v24  }
 0x55b   : > { %v5097_v26 = vpop.permute.xlu0 %5096 }
 0x55c   : > { %v5099_v6 = vunpack.i.h.bf16 %v5097_v26  ;;  %v5098_v29 = vunpack.i.l.bf16 %v5097_v26 }
 0x55e   : > { %v4607_v32 = vpack.c.bf16 %v5099_v6, %v5098_v29 }
 0x55f   : > { %v5107_v19 = vpop.permute.xlu0 %5106 }
 0x560   : > { %4608 = vmatprep.subr.bf16.mxu1 %v4607_v32  ;;  %v5109_v50 = vunpack.i.h.bf16 %v5107_v19  ;;  %v5108_v45 = vunpack.i.l.bf16 %v5107_v19 }
 0x561   : > { %4610 = vmatpush3.bf16.msra.mxu1 %v4607_v32 }
 0x562   : > { %v4623_v41 = vpack.c.bf16 %v5109_v50, %v5108_v45 }
 0x563   : > { %v5117_v42 = vpop.permute.xlu0 %5116 }
 0x564   : > { %v5119_v49 = vunpack.i.h.bf16 %v5117_v42  ;;  %v5118_v61 = vunpack.i.l.bf16 %v5117_v42 }
 0x566   : > { %v4631_v51 = vpack.c.bf16 %v5119_v49, %v5118_v61 }
 0x574   : > { %v3551_v8 = vpop.permute.xlu0 %3550 }
 0x577   : > { %v5102_v36 = vpop.permute.xlu1 %5101 }
 0x578   : > { %v5104_v30 = vunpack.i.h.bf16 %v5102_v36  ;;  %v5103_v2 = vunpack.i.l.bf16 %v5102_v36 }
 0x57a   : > { %v4611_v35 = vpack.c.bf16 %v5104_v30, %v5103_v2 }
 0x57b   : > { %v5112_v3 = vpop.permute.xlu1 %5111 }
 0x57c   : > { %4612 = vmatprep.subr.bf16.mxu1 %v4611_v35  ;;  %v5114_v9 = vunpack.i.h.bf16 %v5112_v3  ;;  %v5113_v31 = vunpack.i.l.bf16 %v5112_v3 }
 0x57d   : > { %4614 = vmatpush3.bf16.msra.mxu1 %v4611_v35 }
 0x57e   : > { %4616 = vmatprep.subr.bf16.mxu1 %v5977_v48  ;;  %v4627_v4 = vpack.c.bf16 %v5114_v9, %v5113_v31 }
 0x57f   : > { %v5122_v7 = vpop.permute.xlu1 %5121 }
 0x580   : > { %4316 = vmatmul.mubr.msk.f32.vlgmr.msra.gmra.mrb[28].mxu1 %vm1151_vm3, %v3738_v28  ;;  %v5124_v44 = vunpack.i.h.bf16 %v5122_v7  ;;  %v5123_v37 = vunpack.i.l.bf16 %v5122_v7 }
 0x581   : > { %4618 = vmatpush3.bf16.msra.mxu1 %v5977_v48  ;;  %4326 = vmatprep.mubr.msk.f32.mxu1 %vm1151_vm3, %v3167_v40 }
 0x582   : > { %4620 = vmatprep.subr.bf16.mxu1 %v4619_v23  ;;  %v4635_v55 = vpack.c.bf16 %v5124_v44, %v5123_v37 }
 0x585   : > { %4622 = vmatpush3.bf16.msra.mxu1 %v4619_v23 }
 0x586   : > { %4624 = vmatprep.subr.bf16.mxu1 %v4623_v41 }
 0x588   : > { %4327 = vmatmul.mubr.msk.f32.vlgmr.msra.gmra.mrb[28].mxu1 %vm1151_vm3, %v3168_v43 }
 0x589   : > { %4626 = vmatpush3.bf16.msra.mxu1 %v4623_v41  ;;  %4337 = vmatprep.mubr.msk.f32.mxu1 %vm1151_vm3, %v3743_v34 }
 0x58a   : > { %4628 = vmatprep.subr.bf16.mxu1 %v4627_v4 }
 0x58d   : > { %4630 = vmatpush3.bf16.msra.mxu1 %v4627_v4 }
 0x58e   : > { %4632 = vmatprep.subr.bf16.mxu1 %v4631_v51 }
 0x590   : > { %4338 = vmatmul.mubr.msk.f32.vlgmr.msra.gmra.mrb[28].mxu1 %vm1151_vm3, %v3744_v52  ;;  %v3556_v48 = vpop.permute.xlu1 %3555 }
 0x591   : > { %4634 = vmatpush3.bf16.msra.mxu1 %v4631_v51  ;;  %4348 = vmatprep.mubr.msk.f32.mxu1 %vm1151_vm3, %v3747_v16 }
 0x592   : > { %4636 = vmatprep.subr.bf16.mxu1 %v4635_v55 }
 0x595   : > { %4638 = vmatpush3.bf16.msra.mxu1 %v4635_v55 }
 0x598   : > { %4349 = vmatmul.mubr.msk.f32.vlgmr.msra.gmra.mrb[28].mxu1 %vm1151_vm3, %v3748_v22 }
 0x66b   : > { %v4350_v38 = vpop.f32.mrb[28].mxu1 }
 0x66c   : > { %v3559_v11 = vadd.f32 %v4350_v38, %v3556_v48  ;;  %v3535_v47 = vpop.f32.mrb[29].mxu1 }
 0x66d   : > { %v3558_v62 = vadd.f32 %v3551_v8, %v3535_v47 }
 0x66e   : > { %3563 = vst.msk [vmem:[%s286_s21 + $0x8] sm:$0x3] %vm3562_vm9, %v3559_v11 }
 0x66f   : > { %3561 = vst.msk [vmem:[%s286_s21] sm:$0xff] %vm3560_vm10, %v3558_v62 }
 0x670 PF: > { %p17_p8 = scmp.ge.s32.totalorder %s5372_s7, 4   ;;  %s6061_s21 = smov %s5255_s22 }
 0x671   : > { %s6062_s22 = smov %s5259_s23  ;;  %s6063_s23 = smov %s5398_s28 }
 0x672   : > { %s6064_s24 = smov %s5372_s7  ;;  %19 = sbr.rel (!%p17_p8) target bundleno = 4 (0x4), region = 106 }
 0x679   :  { %3585 = vsyncpa [#allocation5], 1 }
 0x67a   :  { %3587 = vsyncpa [#allocation5 + $0x1], 1 }
 0x67b   :  { %3588 = vsyncpa [#allocation7], 1 }

</bundles_post_ra>
